<compile_context>
chip_gen: v7x
topology: tpu7x:2x2x1
jax: 0.10.0
libtpu: 0.0.40
codegen_flags: <defaults>
</compile_context>

<pallas_src>
import math

import jax
import jax.numpy as jnp
from jax.experimental import pallas as pl
from jax.experimental.pallas import tpu as pltpu

# ---- static config (small shapes consistent with the module) ----
B = 2              # batch
L = 8              # sequence length
BERT_DIM = 32      # opt.bert_dim
HEADS = 4          # opt.attention_heads
ATTDIM = 100       # self.attdim
DK = ATTDIM // HEADS          # 25  (reference d_k used for the softmax scale)
LAYERS = 2         # num_layers
EPS = 1e-6

# ---- padded sizes (host-side zero padding, numerically exact) ----
AP = 128           # ATTDIM padded to a full vreg lane width
DKP = 32           # per-head dim padded (HEADS * DKP == AP)
WPK_COLS = 5 * AP  # [Wq | Wk | Wd | W | Wn12] blocks, each 128 columns
WPK_ROWS = AP + 8  # rows 0:128 weights, row 128 biases, row 129 bxx; pad to x8

# SMEM scalar pack layout
_WA_OFF = 0        # wa[c, a] at 4*c + a   (16 entries)
_WXB_OFF = 16      # Wx bias               (4 entries)
_BIASM_OFF = 20    # bias_m                (1 entry)
_SCAL_LEN = 32


# ------------------------------------------------------------------- kernel --

def _fused_gcn_bert_kernel(seq_ref, amask_ref, smask_ref, short_ref,
                           wxx_ref, wpk_ref, scal_ref, out_ref):
    bb = seq_ref.shape[0]                       # examples in this block

    # ---- 1) LayerNorm (torch unbiased std; a_2/b_2 folded into Wxx/bxx) ----
    x = seq_ref[...].reshape(bb * L, BERT_DIM)
    mean = jnp.mean(x, axis=-1, keepdims=True)
    c = x - mean
    var = jnp.sum(c * c, axis=-1, keepdims=True) * (1.0 / (BERT_DIM - 1))
    y = c * (1.0 / (jnp.sqrt(var) + EPS))       # exact, matches (x-mean)/(std+eps)
    # bert_drop: identity at inference
    bxx = wpk_ref[AP + 1:AP + 2, 0:AP]          # [1, AP]
    g = jnp.dot(y, wxx_ref[...], preferred_element_type=jnp.float32) + bxx   # [bb*L, AP]
    gb = g.reshape(bb, L, AP)                   # gcn_inputs (padded lanes are 0)

    # ---- 2) masked aspect pooling ------------------------------------------
    am = amask_ref[...][:, 0, :]                # [bb, L]
    wn = jnp.sum(am, axis=-1, keepdims=True)    # [bb, 1]  (no zero-guard: matches ref)
    aspect = jnp.sum(gb * am[:, :, None], axis=1) / wn                       # [bb, AP]

    # ---- 3) MultiHeadAttention -> per-head attention maps -------------------
    wd = wpk_ref[0:AP, 2 * AP:2 * AP + DKP]     # [AP, DKP]
    bd = wpk_ref[AP:AP + 1, 2 * AP:2 * AP + DKP]
    a_d = jnp.dot(aspect, wd, preferred_element_type=jnp.float32) + bd       # [bb, DKP]
    a_db = a_d[:, None, :]                      # hoisted broadcast
    bias_m = scal_ref[_BIASM_OFF]

    # fused Q|K projection: one [128, 256] matmul (Q already scaled by 1/sqrt(d_k))
    wqk = wpk_ref[0:AP, 0:2 * AP]
    bqk = wpk_ref[AP:AP + 1, 0:2 * AP]
    qk = jnp.dot(g, wqk, preferred_element_type=jnp.float32) + bqk           # [bb*L, 2*AP]

    s_heads = []
    for h in range(HEADS):                      # HEADS=4, unrolled; 32-aligned slices
        qh = qk[:, h * DKP:(h + 1) * DKP].reshape(bb, L, DKP)
        kh = qk[:, AP + h * DKP:AP + (h + 1) * DKP].reshape(bb, L, DKP)
        sh = jnp.einsum('bqd,bkd->bqk', qh, kh,
                        preferred_element_type=jnp.float32)                  # [bb, L, L]
        # aspect term is identical for every query row -> per-key score
        asc = jnp.tanh(jnp.sum(kh * a_db, axis=-1) + bias_m)                 # [bb, L]
        s_heads.append(sh + asc[:, None, :])

    # batch mask / short / softmax over all heads (heads folded into axis 0)
    s = jnp.concatenate(s_heads, axis=0)                                     # [H*bb, L, L]
    mask1 = smask_ref[...][:, 0, :][:, None, :]                              # [bb, 1, L]
    maskH = jnp.concatenate([mask1] * HEADS, axis=0)                         # [H*bb, 1, L]
    shortH = jnp.concatenate([short_ref[...]] * HEADS, axis=0)               # [H*bb, L, L]
    s = jnp.where(maskH == 0.0, -1e9, s)        # masked_fill(mask==0, -1e9)
    s = s + shortH
    m = jnp.max(s, axis=-1, keepdims=True)
    e = jnp.exp(s - m)
    p = e * pl.reciprocal(jnp.sum(e, axis=-1, keepdims=True), approx=True)   # softmax
    adj = [p[h * bb:(h + 1) * bb] for h in range(HEADS)]   # attention dropout: identity

    # ---- 4) GCN layers (unrolled) --------------------------------------------
    w_mat = wpk_ref[0:AP, 3 * AP:4 * AP]        # W (already scaled by 1/HEADS)
    wb = wpk_ref[AP:AP + 1, 3 * AP:4 * AP]      # W bias (unscaled)
    wn12 = wpk_ref[0:AP, 4 * AP:4 * AP + 2 * HEADS]   # [Wn1 | Wn2]  -> [AP, 8]

    gcn = gb
    for layer in range(LAYERS):
        # Ax.mean(dim=1) == ((sum_h adj_h) @ x) / HEADS  (1/HEADS folded into W)
        adj_sum = adj[0] + adj[1] + adj[2] + adj[3]
        ax = jnp.einsum('bij,bjd->bid', adj_sum, gcn,
                        preferred_element_type=jnp.float32)
        axf = jnp.dot(ax.reshape(bb * L, AP), w_mat,
                      preferred_element_type=jnp.float32) + wb
        new_x = jnp.maximum(axf, 0.0)           # F.relu
        gcn = new_x.reshape(bb, L, AP)

        if layer < LAYERS - 1:
            # edge = Wx(cat([adj_perm, node_j, node_i])) decomposed:
            #   edge[b,i,j,c] = sum_a wa[c,a]*adj_a[b,i,j]
            #                 + (x@Wn1)[b,j,c] + (x@Wn2)[b,i,c] + wxb[c]
            # Skipped on the last layer: the reference never uses weight_adj
            # after the loop, so the final edge update is dead code.
            g12 = jnp.dot(new_x, wn12,
                          preferred_element_type=jnp.float32).reshape(bb, L, 2 * HEADS)
            new_adj = []
            for cidx in range(HEADS):
                term = scal_ref[_WXB_OFF + cidx] + scal_ref[_WA_OFF + 4 * cidx] * adj[0]
                for a in range(1, HEADS):
                    term = term + scal_ref[_WA_OFF + 4 * cidx + a] * adj[a]
                term = (term
                        + g12[:, :, cidx][:, None, :]             # node_j term
                        + g12[:, :, HEADS + cidx][:, :, None])    # node_i term
                new_adj.append(term)            # edge.permute(0,3,1,2)
            adj = new_adj
        # gcn_drop: identity at inference

    # self.Wi(gcn_outputs) is computed but immediately overwritten in the
    # reference forward; final output is F.relu(gcn_outputs).
    out_ref[...] = jnp.maximum(gcn, 0.0)        # lane-dense [bb, L, AP] store


# ------------------------------------------------------------------ wrapper --

def _batch_spec(full_shape, bb):
    rest = tuple(full_shape[1:])
    zeros = (0,) * len(rest)
    return pl.BlockSpec((bb,) + rest, lambda b: (b,) + zeros)


def _param_spec(full_shape):
    zeros = (0,) * len(full_shape)
    return pl.BlockSpec(tuple(full_shape), lambda b: zeros)


_SMEM_SPEC = pl.BlockSpec(memory_space=pltpu.MemorySpace.SMEM)


def _examples_per_block(batch):
    # Launch/DMA-latency bound at these shapes: fold the whole tiny batch into a
    # single grid step.  On v7x (2 TensorCores) split a larger batch so each
    # core runs exactly one step.
    try:
        kind = jax.devices()[0].device_kind.lower()
    except Exception:
        kind = ""
    if ("v7" in kind or "7x" in kind) and batch > 8 and batch % 2 == 0:
        return batch // 2
    return batch


def gcn_bert_forward(sequence_output, src_mask, aspect_mask, short_mask, packed,
                     examples_per_block=None):
    B_, L_, _ = sequence_output.shape
    bb = examples_per_block if examples_per_block else _examples_per_block(B_)
    if B_ % bb != 0:
        bb = B_
    grid = (B_ // bb,)

    wxx, wpk, scal = packed["wxx"], packed["wpk"], packed["scal"]

    out = pl.pallas_call(
        _fused_gcn_bert_kernel,
        grid=grid,
        in_specs=[
            _batch_spec(sequence_output.shape, bb),
            _batch_spec(aspect_mask.shape, bb),
            _batch_spec(src_mask.shape, bb),
            _batch_spec(short_mask.shape, bb),
            _param_spec(wxx.shape),
            _param_spec(wpk.shape),
            _SMEM_SPEC,
        ],
        out_specs=_batch_spec((B_, L_, AP), bb),
        out_shape=jax.ShapeDtypeStruct((B_, L_, AP), jnp.float32),
        compiler_params=pltpu.CompilerParams(
            dimension_semantics=("parallel",)),
    )(sequence_output, aspect_mask, src_mask, short_mask, wxx, wpk, scal)

    return out[..., :ATTDIM]    # crop padded lanes (they are exactly zero)


# -------------------------------------------------------------- param init --

def init_raw_params(key):
    """Raw parameters in the torch module's logical shapes (input-major)."""
    ks = jax.random.split(key, 12)

    def nrm(k, shape, scale=0.05):
        return (scale * jax.random.normal(k, shape)).astype(jnp.float32)

    return {
        "a2": jnp.ones((BERT_DIM,), jnp.float32),       # LayerNorm a_2
        "b2": jnp.zeros((BERT_DIM,), jnp.float32),      # LayerNorm b_2
        "wxx": nrm(ks[0], (BERT_DIM, ATTDIM)),          # Wxx
        "bxx": nrm(ks[1], (ATTDIM,)),
        "wq": nrm(ks[2], (ATTDIM, ATTDIM)),             # attn.linears[0]
        "bq": nrm(ks[3], (ATTDIM,)),
        "wk": nrm(ks[4], (ATTDIM, ATTDIM)),             # attn.linears[1]
        "bk": nrm(ks[5], (ATTDIM,)),
        "wd": nrm(ks[6], (ATTDIM, DK)),                 # attn.dense
        "bd": nrm(ks[7], (DK,)),
        "bias_m": jnp.float32(0.1),                     # attn.bias_m
        "w": nrm(ks[8], (ATTDIM, ATTDIM)),              # W (shared by both layers)
        "wb": nrm(ks[9], (ATTDIM,)),
        # Wx : Linear(HEADS + 2*ATTDIM, HEADS) split into [adj | node_j | node_i]
        "wa": nrm(ks[10], (HEADS, HEADS)),              # Wx[:, :HEADS]   (wa[c, a])
        "wn1": nrm(ks[11], (ATTDIM, HEADS)),            # Wx[:, H:H+100].T
        "wn2": nrm(jax.random.fold_in(key, 99), (ATTDIM, HEADS)),  # Wx[:, H+100:].T
        "wxb": jnp.zeros((HEADS,), jnp.float32),        # Wx bias
    }


def pack_params(p):
    """Host-side zero-padding, scale folding and packing into 3 kernel inputs."""
    f32 = jnp.float32
    scale_q = 1.0 / math.sqrt(DK)                       # reference d_k = 25

    def pad_mat(wm, rows, cols):
        return jnp.zeros((rows, cols), f32).at[:wm.shape[0], :wm.shape[1]].set(wm)

    def pad_vec(v, n):
        return jnp.zeros((n,), f32).at[:v.shape[0]].set(v)

    def pad_heads_mat(wm):      # [ATTDIM, ATTDIM] -> [AP, AP]; head blocks at 32-lane offsets
        out = jnp.zeros((AP, AP), f32)
        for h in range(HEADS):
            out = out.at[:ATTDIM, h * DKP:h * DKP + DK].set(wm[:, h * DK:(h + 1) * DK])
        return out

    def pad_heads_vec(v):       # [ATTDIM] -> [AP]
        out = jnp.zeros((AP,), f32)
        for h in range(HEADS):
            out = out.at[h * DKP:h * DKP + DK].set(v[h * DK:(h + 1) * DK])
        return out

    # LayerNorm gain/bias folded into Wxx / bxx (exact algebraic identity).
    wxx_f = p["a2"][:, None] * p["wxx"]                 # [32, 100]
    bxx_f = p["b2"] @ p["wxx"] + p["bxx"]               # [100]

    wq_p = pad_heads_mat(p["wq"] * scale_q)             # 1/sqrt(d_k) folded into Q
    bq_p = pad_heads_vec(p["bq"] * scale_q)
    wk_p = pad_heads_mat(p["wk"])
    bk_p = pad_heads_vec(p["bk"])
    wd_p = pad_mat(p["wd"], AP, DKP)
    bd_p = pad_vec(p["bd"], DKP)
    w_p = pad_mat(p["w"] * (1.0 / HEADS), AP, AP)       # Ax.mean's 1/HEADS folded in
    wb_p = pad_vec(p["wb"], AP)                         # bias NOT scaled
    wn12_p = pad_mat(jnp.concatenate([p["wn1"], p["wn2"]], axis=1), AP, 2 * HEADS)

    wpk = jnp.zeros((WPK_ROWS, WPK_COLS), f32)
    wpk = wpk.at[:AP, 0:AP].set(wq_p)
    wpk = wpk.at[:AP, AP:2 * AP].set(wk_p)
    wpk = wpk.at[:AP, 2 * AP:2 * AP + DKP].set(wd_p)
    wpk = wpk.at[:AP, 3 * AP:4 * AP].set(w_p)
    wpk = wpk.at[:AP, 4 * AP:4 * AP + 2 * HEADS].set(wn12_p)
    wpk = wpk.at[AP, 0:AP].set(bq_p)
    wpk = wpk.at[AP, AP:2 * AP].set(bk_p)
    wpk = wpk.at[AP, 2 * AP:2 * AP + DKP].set(bd_p)
    wpk = wpk.at[AP, 3 * AP:4 * AP].set(wb_p)
    wpk = wpk.at[AP + 1, 0:AP].set(pad_vec(bxx_f, AP))

    scal = jnp.zeros((_SCAL_LEN,), f32)
    scal = scal.at[_WA_OFF:_WA_OFF + HEADS * HEADS].set(p["wa"].reshape(-1))
    scal = scal.at[_WXB_OFF:_WXB_OFF + HEADS].set(p["wxb"])
    scal = scal.at[_BIASM_OFF].set(p["bias_m"])

    return {"wxx": pad_mat(wxx_f, BERT_DIM, AP), "wpk": wpk, "scal": scal}


if __name__ == "__main__":
    key = jax.random.PRNGKey(0)
    k_seq, k_short, k_p = jax.random.split(key, 3)

    # sequence_output stands in for bert(...)[0] passed through spectformer.
    sequence_output = jax.random.normal(k_seq, (B, L, BERT_DIM), jnp.float32)
    # src_mask (already unsqueezed to [B, 1, L]); last two tokens of example 1 padded
    src_mask = jnp.ones((B, 1, L), jnp.float32).at[1, 0, L - 2:].set(0.0)
    # aspect_mask [B, 1, L]: a couple of aspect tokens per example
    aspect_mask = jnp.zeros((B, 1, L), jnp.float32).at[:, 0, 2:4].set(1.0)
    # short_mask [B, L, L] broadcast over heads when added to scores
    short_mask = 0.1 * jax.random.normal(k_short, (B, L, L), jnp.float32)

    raw_params = init_raw_params(k_p)
    packed = pack_params(raw_params)

    out = gcn_bert_forward(sequence_output, src_mask, aspect_mask, short_mask, packed)
    out = jax.block_until_ready(out)
    assert out.shape == (B, L, ATTDIM) and out.dtype == jnp.float32
    assert bool(jnp.isfinite(out).all())
    print("KERNEL_OK")
</pallas_src>

<mosaic_0001>
module attributes {stable_mosaic.version = 11 : i64} {
  func.func @_fused_gcn_bert_kernel(%arg0: i32, %arg1: memref<2x8x32xf32, #tpu.memory_space<vmem>>, %arg2: memref<2x1x8xf32, #tpu.memory_space<vmem>>, %arg3: memref<2x1x8xf32, #tpu.memory_space<vmem>>, %arg4: memref<2x8x8xf32, #tpu.memory_space<vmem>>, %arg5: memref<32x128xf32, #tpu.memory_space<vmem>>, %arg6: memref<136x640xf32, #tpu.memory_space<vmem>>, %arg7: memref<32xf32, #tpu.memory_space<smem>>, %arg8: memref<2x8x128xf32, #tpu.memory_space<vmem>>) attributes {dimension_semantics = [#tpu.dimension_semantics<parallel>], iteration_bounds = array<i64: 1>, scalar_prefetch = 0 : i64, scratch_operands = 0 : i64, tpu.core_type = #tpu.core_type<tc>, window_params = [{transform_indices = @transform_0, window_bounds = array<i64: 2, 8, 32>}, {transform_indices = @transform_1, window_bounds = array<i64: 2, 1, 8>}, {transform_indices = @transform_2, window_bounds = array<i64: 2, 1, 8>}, {transform_indices = @transform_3, window_bounds = array<i64: 2, 8, 8>}, {pipeline_mode = #tpu.pipeline_mode<synchronous>, transform_indices = @transform_4, window_bounds = array<i64: 32, 128>}, {pipeline_mode = #tpu.pipeline_mode<synchronous>, transform_indices = @transform_5, window_bounds = array<i64: 136, 640>}, {transform_indices = @transform_6, window_bounds = array<i64: 32>}, {transform_indices = @transform_7, window_bounds = array<i64: 2, 8, 128>}]} {
    %c0 = arith.constant 0 : index
    %c0_0 = arith.constant 0 : index
    %c0_1 = arith.constant 0 : index
    %0 = vector.load %arg1[%c0, %c0_0, %c0_1] : memref<2x8x32xf32, #tpu.memory_space<vmem>>, vector<2x8x32xf32>
    %1 = vector.shape_cast %0 : vector<2x8x32xf32> to vector<16x32xf32>
    %cst = arith.constant dense<0.000000e+00> : vector<16xf32>
    %2 = vector.multi_reduction <add>, %1, %cst [1] : vector<16x32xf32> to vector<16xf32>
    %3 = vector.shape_cast %2 : vector<16xf32> to vector<16x1xf32>
    %cst_2 = arith.constant 3.200000e+01 : f32
    %4 = vector.broadcast %cst_2 : f32 to vector<16x1xf32>
    %5 = arith.divf %3, %4 : vector<16x1xf32>
    %6 = vector.broadcast %5 : vector<16x1xf32> to vector<16x32xf32>
    %7 = arith.subf %1, %6 : vector<16x32xf32>
    %8 = arith.mulf %7, %7 : vector<16x32xf32>
    %cst_3 = arith.constant dense<0.000000e+00> : vector<16xf32>
    %9 = vector.multi_reduction <add>, %8, %cst_3 [1] : vector<16x32xf32> to vector<16xf32>
    %10 = vector.shape_cast %9 : vector<16xf32> to vector<16x1xf32>
    %cst_4 = arith.constant 0.0322580636 : f32
    %11 = vector.broadcast %cst_4 : f32 to vector<16x1xf32>
    %12 = arith.mulf %10, %11 : vector<16x1xf32>
    %13 = math.sqrt %12 : vector<16x1xf32>
    %cst_5 = arith.constant 9.99999997E-7 : f32
    %14 = vector.broadcast %cst_5 : f32 to vector<16x1xf32>
    %15 = arith.addf %13, %14 : vector<16x1xf32>
    %cst_6 = arith.constant 1.000000e+00 : f32
    %16 = vector.broadcast %cst_6 : f32 to vector<16x1xf32>
    %17 = arith.divf %16, %15 : vector<16x1xf32>
    %18 = vector.broadcast %17 : vector<16x1xf32> to vector<16x32xf32>
    %19 = arith.mulf %7, %18 : vector<16x32xf32>
    %c129 = arith.constant 129 : index
    %c0_7 = arith.constant 0 : index
    %20 = vector.load %arg6[%c129, %c0_7] : memref<136x640xf32, #tpu.memory_space<vmem>>, vector<1x128xf32>
    %c0_8 = arith.constant 0 : index
    %c0_9 = arith.constant 0 : index
    %21 = vector.load %arg5[%c0_8, %c0_9] : memref<32x128xf32, #tpu.memory_space<vmem>>, vector<32x128xf32>
    %cst_10 = arith.constant dense<0.000000e+00> : vector<16x128xf32>
    %22 = tpu.matmul %19, %21, %cst_10 {dimension_numbers = #tpu.dot_dimension_numbers<[1], [0], [0], [1], [0, 0, 1, 1], [], []>} : vector<16x32xf32>, vector<32x128xf32>, vector<16x128xf32> -> vector<16x128xf32>
    %23 = vector.broadcast %20 : vector<1x128xf32> to vector<16x128xf32>
    %24 = arith.addf %22, %23 : vector<16x128xf32>
    %25 = vector.shape_cast %24 : vector<16x128xf32> to vector<2x8x128xf32>
    %c0_11 = arith.constant 0 : index
    %c0_12 = arith.constant 0 : index
    %c0_13 = arith.constant 0 : index
    %26 = vector.load %arg2[%c0_11, %c0_12, %c0_13] : memref<2x1x8xf32, #tpu.memory_space<vmem>>, vector<2x1x8xf32>
    %27 = vector.shape_cast %26 : vector<2x1x8xf32> to vector<2x8xf32>
    %cst_14 = arith.constant dense<0.000000e+00> : vector<2xf32>
    %28 = vector.multi_reduction <add>, %27, %cst_14 [1] : vector<2x8xf32> to vector<2xf32>
    %29 = vector.shape_cast %28 : vector<2xf32> to vector<2x1xf32>
    %30 = vector.shape_cast %27 : vector<2x8xf32> to vector<2x8x1xf32>
    %31 = vector.broadcast %30 : vector<2x8x1xf32> to vector<2x8x128xf32>
    %32 = arith.mulf %25, %31 : vector<2x8x128xf32>
    %cst_15 = arith.constant dense<0.000000e+00> : vector<2x128xf32>
    %33 = vector.multi_reduction <add>, %32, %cst_15 [1] : vector<2x8x128xf32> to vector<2x128xf32>
    %34 = vector.broadcast %29 : vector<2x1xf32> to vector<2x128xf32>
    %35 = arith.divf %33, %34 : vector<2x128xf32>
    %c0_16 = arith.constant 0 : index
    %c256 = arith.constant 256 : index
    %36 = vector.load %arg6[%c0_16, %c256] : memref<136x640xf32, #tpu.memory_space<vmem>>, vector<128x32xf32>
    %c128 = arith.constant 128 : index
    %c256_17 = arith.constant 256 : index
    %37 = vector.load %arg6[%c128, %c256_17] : memref<136x640xf32, #tpu.memory_space<vmem>>, vector<1x32xf32>
    %cst_18 = arith.constant dense<0.000000e+00> : vector<2x32xf32>
    %38 = tpu.matmul %35, %36, %cst_18 {dimension_numbers = #tpu.dot_dimension_numbers<[1], [0], [0], [1], [0, 0, 1, 1], [], []>} : vector<2x128xf32>, vector<128x32xf32>, vector<2x32xf32> -> vector<2x32xf32>
    %39 = vector.broadcast %37 : vector<1x32xf32> to vector<2x32xf32>
    %40 = arith.addf %38, %39 : vector<2x32xf32>
    %41 = vector.shape_cast %40 : vector<2x32xf32> to vector<2x1x32xf32>
    %c20 = arith.constant 20 : index
    %42 = memref.load %arg7[%c20] : memref<32xf32, #tpu.memory_space<smem>>
    %c0_19 = arith.constant 0 : index
    %c0_20 = arith.constant 0 : index
    %43 = vector.load %arg6[%c0_19, %c0_20] : memref<136x640xf32, #tpu.memory_space<vmem>>, vector<128x256xf32>
    %c128_21 = arith.constant 128 : index
    %c0_22 = arith.constant 0 : index
    %44 = vector.load %arg6[%c128_21, %c0_22] : memref<136x640xf32, #tpu.memory_space<vmem>>, vector<1x256xf32>
    %cst_23 = arith.constant dense<0.000000e+00> : vector<16x256xf32>
    %45 = tpu.matmul %24, %43, %cst_23 {dimension_numbers = #tpu.dot_dimension_numbers<[1], [0], [0], [1], [0, 0, 1, 1], [], []>} : vector<16x128xf32>, vector<128x256xf32>, vector<16x256xf32> -> vector<16x256xf32>
    %46 = vector.broadcast %44 : vector<1x256xf32> to vector<16x256xf32>
    %47 = arith.addf %45, %46 : vector<16x256xf32>
    %48 = vector.extract_strided_slice %47 {offsets = [0, 0], sizes = [16, 32], strides = [1, 1]} : vector<16x256xf32> to vector<16x32xf32>
    %49 = vector.shape_cast %48 : vector<16x32xf32> to vector<2x8x32xf32>
    %50 = vector.extract_strided_slice %47 {offsets = [0, 128], sizes = [16, 32], strides = [1, 1]} : vector<16x256xf32> to vector<16x32xf32>
    %51 = vector.shape_cast %50 : vector<16x32xf32> to vector<2x8x32xf32>
    "tpu.trace_start"() <{level = 10 : i32, message = "bqd,bkd->bqk"}> : () -> ()
    %cst_24 = arith.constant dense<0.000000e+00> : vector<2x8x8xf32>
    %52 = tpu.matmul %49, %51, %cst_24 {dimension_numbers = #tpu.dot_dimension_numbers<[2], [2], [1], [1], [0, 0, 0, 1, 1, 1], [0], [0]>} : vector<2x8x32xf32>, vector<2x8x32xf32>, vector<2x8x8xf32> -> vector<2x8x8xf32>
    "tpu.trace_stop"() : () -> ()
    %53 = vector.broadcast %41 : vector<2x1x32xf32> to vector<2x8x32xf32>
    %54 = arith.mulf %51, %53 : vector<2x8x32xf32>
    %cst_25 = arith.constant dense<0.000000e+00> : vector<2x8xf32>
    %55 = vector.multi_reduction <add>, %54, %cst_25 [2] : vector<2x8x32xf32> to vector<2x8xf32>
    %56 = vector.broadcast %42 : f32 to vector<2x8xf32>
    %57 = arith.addf %55, %56 : vector<2x8xf32>
    %58 = math.tanh %57 : vector<2x8xf32>
    %59 = vector.shape_cast %58 : vector<2x8xf32> to vector<2x1x8xf32>
    %60 = vector.broadcast %59 : vector<2x1x8xf32> to vector<2x8x8xf32>
    %61 = arith.addf %52, %60 : vector<2x8x8xf32>
    %62 = vector.extract_strided_slice %47 {offsets = [0, 32], sizes = [16, 32], strides = [1, 1]} : vector<16x256xf32> to vector<16x32xf32>
    %63 = vector.shape_cast %62 : vector<16x32xf32> to vector<2x8x32xf32>
    %64 = vector.extract_strided_slice %47 {offsets = [0, 160], sizes = [16, 32], strides = [1, 1]} : vector<16x256xf32> to vector<16x32xf32>
    %65 = vector.shape_cast %64 : vector<16x32xf32> to vector<2x8x32xf32>
    "tpu.trace_start"() <{level = 10 : i32, message = "bqd,bkd->bqk"}> : () -> ()
    %cst_26 = arith.constant dense<0.000000e+00> : vector<2x8x8xf32>
    %66 = tpu.matmul %63, %65, %cst_26 {dimension_numbers = #tpu.dot_dimension_numbers<[2], [2], [1], [1], [0, 0, 0, 1, 1, 1], [0], [0]>} : vector<2x8x32xf32>, vector<2x8x32xf32>, vector<2x8x8xf32> -> vector<2x8x8xf32>
    "tpu.trace_stop"() : () -> ()
    %67 = vector.broadcast %41 : vector<2x1x32xf32> to vector<2x8x32xf32>
    %68 = arith.mulf %65, %67 : vector<2x8x32xf32>
    %cst_27 = arith.constant dense<0.000000e+00> : vector<2x8xf32>
    %69 = vector.multi_reduction <add>, %68, %cst_27 [2] : vector<2x8x32xf32> to vector<2x8xf32>
    %70 = vector.broadcast %42 : f32 to vector<2x8xf32>
    %71 = arith.addf %69, %70 : vector<2x8xf32>
    %72 = math.tanh %71 : vector<2x8xf32>
    %73 = vector.shape_cast %72 : vector<2x8xf32> to vector<2x1x8xf32>
    %74 = vector.broadcast %73 : vector<2x1x8xf32> to vector<2x8x8xf32>
    %75 = arith.addf %66, %74 : vector<2x8x8xf32>
    %76 = vector.extract_strided_slice %47 {offsets = [0, 64], sizes = [16, 32], strides = [1, 1]} : vector<16x256xf32> to vector<16x32xf32>
    %77 = vector.shape_cast %76 : vector<16x32xf32> to vector<2x8x32xf32>
    %78 = vector.extract_strided_slice %47 {offsets = [0, 192], sizes = [16, 32], strides = [1, 1]} : vector<16x256xf32> to vector<16x32xf32>
    %79 = vector.shape_cast %78 : vector<16x32xf32> to vector<2x8x32xf32>
    "tpu.trace_start"() <{level = 10 : i32, message = "bqd,bkd->bqk"}> : () -> ()
    %cst_28 = arith.constant dense<0.000000e+00> : vector<2x8x8xf32>
    %80 = tpu.matmul %77, %79, %cst_28 {dimension_numbers = #tpu.dot_dimension_numbers<[2], [2], [1], [1], [0, 0, 0, 1, 1, 1], [0], [0]>} : vector<2x8x32xf32>, vector<2x8x32xf32>, vector<2x8x8xf32> -> vector<2x8x8xf32>
    "tpu.trace_stop"() : () -> ()
    %81 = vector.broadcast %41 : vector<2x1x32xf32> to vector<2x8x32xf32>
    %82 = arith.mulf %79, %81 : vector<2x8x32xf32>
    %cst_29 = arith.constant dense<0.000000e+00> : vector<2x8xf32>
    %83 = vector.multi_reduction <add>, %82, %cst_29 [2] : vector<2x8x32xf32> to vector<2x8xf32>
    %84 = vector.broadcast %42 : f32 to vector<2x8xf32>
    %85 = arith.addf %83, %84 : vector<2x8xf32>
    %86 = math.tanh %85 : vector<2x8xf32>
    %87 = vector.shape_cast %86 : vector<2x8xf32> to vector<2x1x8xf32>
    %88 = vector.broadcast %87 : vector<2x1x8xf32> to vector<2x8x8xf32>
    %89 = arith.addf %80, %88 : vector<2x8x8xf32>
    %90 = vector.extract_strided_slice %47 {offsets = [0, 96], sizes = [16, 32], strides = [1, 1]} : vector<16x256xf32> to vector<16x32xf32>
    %91 = vector.shape_cast %90 : vector<16x32xf32> to vector<2x8x32xf32>
    %92 = vector.extract_strided_slice %47 {offsets = [0, 224], sizes = [16, 32], strides = [1, 1]} : vector<16x256xf32> to vector<16x32xf32>
    %93 = vector.shape_cast %92 : vector<16x32xf32> to vector<2x8x32xf32>
    "tpu.trace_start"() <{level = 10 : i32, message = "bqd,bkd->bqk"}> : () -> ()
    %cst_30 = arith.constant dense<0.000000e+00> : vector<2x8x8xf32>
    %94 = tpu.matmul %91, %93, %cst_30 {dimension_numbers = #tpu.dot_dimension_numbers<[2], [2], [1], [1], [0, 0, 0, 1, 1, 1], [0], [0]>} : vector<2x8x32xf32>, vector<2x8x32xf32>, vector<2x8x8xf32> -> vector<2x8x8xf32>
    "tpu.trace_stop"() : () -> ()
    %95 = vector.broadcast %41 : vector<2x1x32xf32> to vector<2x8x32xf32>
    %96 = arith.mulf %93, %95 : vector<2x8x32xf32>
    %cst_31 = arith.constant dense<0.000000e+00> : vector<2x8xf32>
    %97 = vector.multi_reduction <add>, %96, %cst_31 [2] : vector<2x8x32xf32> to vector<2x8xf32>
    %98 = vector.broadcast %42 : f32 to vector<2x8xf32>
    %99 = arith.addf %97, %98 : vector<2x8xf32>
    %100 = math.tanh %99 : vector<2x8xf32>
    %101 = vector.shape_cast %100 : vector<2x8xf32> to vector<2x1x8xf32>
    %102 = vector.broadcast %101 : vector<2x1x8xf32> to vector<2x8x8xf32>
    %103 = arith.addf %94, %102 : vector<2x8x8xf32>
    %104 = tpu.concatenate %61, %75, %89, %103 in 0 : vector<2x8x8xf32>, vector<2x8x8xf32>, vector<2x8x8xf32>, vector<2x8x8xf32> -> vector<8x8x8xf32>
    %c0_32 = arith.constant 0 : index
    %c0_33 = arith.constant 0 : index
    %c0_34 = arith.constant 0 : index
    %105 = vector.load %arg3[%c0_32, %c0_33, %c0_34] : memref<2x1x8xf32, #tpu.memory_space<vmem>>, vector<2x1x8xf32>
    %106 = vector.shape_cast %105 : vector<2x1x8xf32> to vector<2x8xf32>
    %107 = vector.shape_cast %106 : vector<2x8xf32> to vector<2x1x8xf32>
    %108 = tpu.concatenate %107, %107, %107, %107 in 0 : vector<2x1x8xf32>, vector<2x1x8xf32>, vector<2x1x8xf32>, vector<2x1x8xf32> -> vector<8x1x8xf32>
    %c0_35 = arith.constant 0 : index
    %c0_36 = arith.constant 0 : index
    %c0_37 = arith.constant 0 : index
    %109 = vector.load %arg4[%c0_35, %c0_36, %c0_37] : memref<2x8x8xf32, #tpu.memory_space<vmem>>, vector<2x8x8xf32>
    %110 = tpu.concatenate %109, %109, %109, %109 in 0 : vector<2x8x8xf32>, vector<2x8x8xf32>, vector<2x8x8xf32>, vector<2x8x8xf32> -> vector<8x8x8xf32>
    %cst_38 = arith.constant 0.000000e+00 : f32
    %111 = vector.broadcast %cst_38 : f32 to vector<8x1x8xf32>
    %112 = arith.cmpf oeq, %108, %111 : vector<8x1x8xf32>
    %cst_39 = arith.constant -1.000000e+09 : f32
    %113 = vector.shape_cast %112 : vector<8x1x8xi1> to vector<8x1x8xi1>
    %114 = vector.broadcast %113 : vector<8x1x8xi1> to vector<8x8x8xi1>
    %115 = vector.broadcast %cst_39 : f32 to vector<8x8x8xf32>
    %116 = arith.select %114, %115, %104 : vector<8x8x8xi1>, vector<8x8x8xf32>
    %117 = arith.addf %116, %110 : vector<8x8x8xf32>
    %cst_40 = arith.constant dense<0xFF800000> : vector<8x8xf32>
    %118 = vector.multi_reduction <maximumf>, %117, %cst_40 [2] : vector<8x8x8xf32> to vector<8x8xf32>
    %119 = vector.shape_cast %118 : vector<8x8xf32> to vector<8x8x1xf32>
    %120 = vector.broadcast %119 : vector<8x8x1xf32> to vector<8x8x8xf32>
    %121 = arith.subf %117, %120 : vector<8x8x8xf32>
    %122 = math.exp %121 : vector<8x8x8xf32>
    %cst_41 = arith.constant dense<0.000000e+00> : vector<8x8xf32>
    %123 = vector.multi_reduction <add>, %122, %cst_41 [2] : vector<8x8x8xf32> to vector<8x8xf32>
    %124 = vector.shape_cast %123 : vector<8x8xf32> to vector<8x8x1xf32>
    %125 = tpu.reciprocal %124 {approx = true} : vector<8x8x1xf32> -> vector<8x8x1xf32>
    %126 = vector.broadcast %125 : vector<8x8x1xf32> to vector<8x8x8xf32>
    %127 = arith.mulf %122, %126 : vector<8x8x8xf32>
    %128 = vector.extract_strided_slice %127 {offsets = [0, 0, 0], sizes = [2, 8, 8], strides = [1, 1, 1]} : vector<8x8x8xf32> to vector<2x8x8xf32>
    %129 = vector.extract_strided_slice %127 {offsets = [2, 0, 0], sizes = [2, 8, 8], strides = [1, 1, 1]} : vector<8x8x8xf32> to vector<2x8x8xf32>
    %130 = vector.extract_strided_slice %127 {offsets = [4, 0, 0], sizes = [2, 8, 8], strides = [1, 1, 1]} : vector<8x8x8xf32> to vector<2x8x8xf32>
    %131 = vector.extract_strided_slice %127 {offsets = [6, 0, 0], sizes = [2, 8, 8], strides = [1, 1, 1]} : vector<8x8x8xf32> to vector<2x8x8xf32>
    %c0_42 = arith.constant 0 : index
    %c384 = arith.constant 384 : index
    %132 = vector.load %arg6[%c0_42, %c384] : memref<136x640xf32, #tpu.memory_space<vmem>>, vector<128x128xf32>
    %c128_43 = arith.constant 128 : index
    %c384_44 = arith.constant 384 : index
    %133 = vector.load %arg6[%c128_43, %c384_44] : memref<136x640xf32, #tpu.memory_space<vmem>>, vector<1x128xf32>
    %c0_45 = arith.constant 0 : index
    %c512 = arith.constant 512 : index
    %134 = vector.load %arg6[%c0_45, %c512] : memref<136x640xf32, #tpu.memory_space<vmem>>, vector<128x8xf32>
    %135 = arith.addf %128, %129 : vector<2x8x8xf32>
    %136 = arith.addf %135, %130 : vector<2x8x8xf32>
    %137 = arith.addf %136, %131 : vector<2x8x8xf32>
    "tpu.trace_start"() <{level = 10 : i32, message = "bij,bjd->bid"}> : () -> ()
    %cst_46 = arith.constant dense<0.000000e+00> : vector<2x8x128xf32>
    %138 = tpu.matmul %137, %25, %cst_46 {dimension_numbers = #tpu.dot_dimension_numbers<[2], [1], [1], [2], [0, 0, 0, 1, 1, 2], [0], [0]>} : vector<2x8x8xf32>, vector<2x8x128xf32>, vector<2x8x128xf32> -> vector<2x8x128xf32>
    "tpu.trace_stop"() : () -> ()
    %139 = vector.shape_cast %138 : vector<2x8x128xf32> to vector<16x128xf32>
    %cst_47 = arith.constant dense<0.000000e+00> : vector<16x128xf32>
    %140 = tpu.matmul %139, %132, %cst_47 {dimension_numbers = #tpu.dot_dimension_numbers<[1], [0], [0], [1], [0, 0, 1, 1], [], []>} : vector<16x128xf32>, vector<128x128xf32>, vector<16x128xf32> -> vector<16x128xf32>
    %141 = vector.broadcast %133 : vector<1x128xf32> to vector<16x128xf32>
    %142 = arith.addf %140, %141 : vector<16x128xf32>
    %cst_48 = arith.constant 0.000000e+00 : f32
    %143 = vector.broadcast %cst_48 : f32 to vector<16x128xf32>
    %144 = arith.maximumf %142, %143 : vector<16x128xf32>
    %145 = vector.shape_cast %144 : vector<16x128xf32> to vector<2x8x128xf32>
    %cst_49 = arith.constant dense<0.000000e+00> : vector<16x8xf32>
    %146 = tpu.matmul %144, %134, %cst_49 {dimension_numbers = #tpu.dot_dimension_numbers<[1], [0], [0], [1], [0, 0, 1, 1], [], []>} : vector<16x128xf32>, vector<128x8xf32>, vector<16x8xf32> -> vector<16x8xf32>
    %147 = vector.shape_cast %146 : vector<16x8xf32> to vector<2x8x8xf32>
    %c16 = arith.constant 16 : index
    %148 = memref.load %arg7[%c16] : memref<32xf32, #tpu.memory_space<smem>>
    %c0_50 = arith.constant 0 : index
    %149 = memref.load %arg7[%c0_50] : memref<32xf32, #tpu.memory_space<smem>>
    %150 = vector.broadcast %149 : f32 to vector<2x8x8xf32>
    %151 = arith.mulf %150, %128 : vector<2x8x8xf32>
    %152 = vector.broadcast %148 : f32 to vector<2x8x8xf32>
    %153 = arith.addf %152, %151 : vector<2x8x8xf32>
    %c1 = arith.constant 1 : index
    %154 = memref.load %arg7[%c1] : memref<32xf32, #tpu.memory_space<smem>>
    %155 = vector.broadcast %154 : f32 to vector<2x8x8xf32>
    %156 = arith.mulf %155, %129 : vector<2x8x8xf32>
    %157 = arith.addf %153, %156 : vector<2x8x8xf32>
    %c2 = arith.constant 2 : index
    %158 = memref.load %arg7[%c2] : memref<32xf32, #tpu.memory_space<smem>>
    %159 = vector.broadcast %158 : f32 to vector<2x8x8xf32>
    %160 = arith.mulf %159, %130 : vector<2x8x8xf32>
    %161 = arith.addf %157, %160 : vector<2x8x8xf32>
    %c3 = arith.constant 3 : index
    %162 = memref.load %arg7[%c3] : memref<32xf32, #tpu.memory_space<smem>>
    %163 = vector.broadcast %162 : f32 to vector<2x8x8xf32>
    %164 = arith.mulf %163, %131 : vector<2x8x8xf32>
    %165 = arith.addf %161, %164 : vector<2x8x8xf32>
    %166 = vector.extract_strided_slice %147 {offsets = [0, 0, 0], sizes = [2, 8, 1], strides = [1, 1, 1]} : vector<2x8x8xf32> to vector<2x8x1xf32>
    %167 = vector.shape_cast %166 : vector<2x8x1xf32> to vector<2x8xf32>
    %168 = vector.shape_cast %167 : vector<2x8xf32> to vector<2x1x8xf32>
    %169 = vector.broadcast %168 : vector<2x1x8xf32> to vector<2x8x8xf32>
    %170 = arith.addf %165, %169 : vector<2x8x8xf32>
    %171 = vector.extract_strided_slice %147 {offsets = [0, 0, 4], sizes = [2, 8, 1], strides = [1, 1, 1]} : vector<2x8x8xf32> to vector<2x8x1xf32>
    %172 = vector.shape_cast %171 : vector<2x8x1xf32> to vector<2x8xf32>
    %173 = vector.shape_cast %172 : vector<2x8xf32> to vector<2x8x1xf32>
    %174 = vector.broadcast %173 : vector<2x8x1xf32> to vector<2x8x8xf32>
    %175 = arith.addf %170, %174 : vector<2x8x8xf32>
    %c17 = arith.constant 17 : index
    %176 = memref.load %arg7[%c17] : memref<32xf32, #tpu.memory_space<smem>>
    %c4 = arith.constant 4 : index
    %177 = memref.load %arg7[%c4] : memref<32xf32, #tpu.memory_space<smem>>
    %178 = vector.broadcast %177 : f32 to vector<2x8x8xf32>
    %179 = arith.mulf %178, %128 : vector<2x8x8xf32>
    %180 = vector.broadcast %176 : f32 to vector<2x8x8xf32>
    %181 = arith.addf %180, %179 : vector<2x8x8xf32>
    %c5 = arith.constant 5 : index
    %182 = memref.load %arg7[%c5] : memref<32xf32, #tpu.memory_space<smem>>
    %183 = vector.broadcast %182 : f32 to vector<2x8x8xf32>
    %184 = arith.mulf %183, %129 : vector<2x8x8xf32>
    %185 = arith.addf %181, %184 : vector<2x8x8xf32>
    %c6 = arith.constant 6 : index
    %186 = memref.load %arg7[%c6] : memref<32xf32, #tpu.memory_space<smem>>
    %187 = vector.broadcast %186 : f32 to vector<2x8x8xf32>
    %188 = arith.mulf %187, %130 : vector<2x8x8xf32>
    %189 = arith.addf %185, %188 : vector<2x8x8xf32>
    %c7 = arith.constant 7 : index
    %190 = memref.load %arg7[%c7] : memref<32xf32, #tpu.memory_space<smem>>
    %191 = vector.broadcast %190 : f32 to vector<2x8x8xf32>
    %192 = arith.mulf %191, %131 : vector<2x8x8xf32>
    %193 = arith.addf %189, %192 : vector<2x8x8xf32>
    %194 = vector.extract_strided_slice %147 {offsets = [0, 0, 1], sizes = [2, 8, 1], strides = [1, 1, 1]} : vector<2x8x8xf32> to vector<2x8x1xf32>
    %195 = vector.shape_cast %194 : vector<2x8x1xf32> to vector<2x8xf32>
    %196 = vector.shape_cast %195 : vector<2x8xf32> to vector<2x1x8xf32>
    %197 = vector.broadcast %196 : vector<2x1x8xf32> to vector<2x8x8xf32>
    %198 = arith.addf %193, %197 : vector<2x8x8xf32>
    %199 = vector.extract_strided_slice %147 {offsets = [0, 0, 5], sizes = [2, 8, 1], strides = [1, 1, 1]} : vector<2x8x8xf32> to vector<2x8x1xf32>
    %200 = vector.shape_cast %199 : vector<2x8x1xf32> to vector<2x8xf32>
    %201 = vector.shape_cast %200 : vector<2x8xf32> to vector<2x8x1xf32>
    %202 = vector.broadcast %201 : vector<2x8x1xf32> to vector<2x8x8xf32>
    %203 = arith.addf %198, %202 : vector<2x8x8xf32>
    %c18 = arith.constant 18 : index
    %204 = memref.load %arg7[%c18] : memref<32xf32, #tpu.memory_space<smem>>
    %c8 = arith.constant 8 : index
    %205 = memref.load %arg7[%c8] : memref<32xf32, #tpu.memory_space<smem>>
    %206 = vector.broadcast %205 : f32 to vector<2x8x8xf32>
    %207 = arith.mulf %206, %128 : vector<2x8x8xf32>
    %208 = vector.broadcast %204 : f32 to vector<2x8x8xf32>
    %209 = arith.addf %208, %207 : vector<2x8x8xf32>
    %c9 = arith.constant 9 : index
    %210 = memref.load %arg7[%c9] : memref<32xf32, #tpu.memory_space<smem>>
    %211 = vector.broadcast %210 : f32 to vector<2x8x8xf32>
    %212 = arith.mulf %211, %129 : vector<2x8x8xf32>
    %213 = arith.addf %209, %212 : vector<2x8x8xf32>
    %c10 = arith.constant 10 : index
    %214 = memref.load %arg7[%c10] : memref<32xf32, #tpu.memory_space<smem>>
    %215 = vector.broadcast %214 : f32 to vector<2x8x8xf32>
    %216 = arith.mulf %215, %130 : vector<2x8x8xf32>
    %217 = arith.addf %213, %216 : vector<2x8x8xf32>
    %c11 = arith.constant 11 : index
    %218 = memref.load %arg7[%c11] : memref<32xf32, #tpu.memory_space<smem>>
    %219 = vector.broadcast %218 : f32 to vector<2x8x8xf32>
    %220 = arith.mulf %219, %131 : vector<2x8x8xf32>
    %221 = arith.addf %217, %220 : vector<2x8x8xf32>
    %222 = vector.extract_strided_slice %147 {offsets = [0, 0, 2], sizes = [2, 8, 1], strides = [1, 1, 1]} : vector<2x8x8xf32> to vector<2x8x1xf32>
    %223 = vector.shape_cast %222 : vector<2x8x1xf32> to vector<2x8xf32>
    %224 = vector.shape_cast %223 : vector<2x8xf32> to vector<2x1x8xf32>
    %225 = vector.broadcast %224 : vector<2x1x8xf32> to vector<2x8x8xf32>
    %226 = arith.addf %221, %225 : vector<2x8x8xf32>
    %227 = vector.extract_strided_slice %147 {offsets = [0, 0, 6], sizes = [2, 8, 1], strides = [1, 1, 1]} : vector<2x8x8xf32> to vector<2x8x1xf32>
    %228 = vector.shape_cast %227 : vector<2x8x1xf32> to vector<2x8xf32>
    %229 = vector.shape_cast %228 : vector<2x8xf32> to vector<2x8x1xf32>
    %230 = vector.broadcast %229 : vector<2x8x1xf32> to vector<2x8x8xf32>
    %231 = arith.addf %226, %230 : vector<2x8x8xf32>
    %c19 = arith.constant 19 : index
    %232 = memref.load %arg7[%c19] : memref<32xf32, #tpu.memory_space<smem>>
    %c12 = arith.constant 12 : index
    %233 = memref.load %arg7[%c12] : memref<32xf32, #tpu.memory_space<smem>>
    %234 = vector.broadcast %233 : f32 to vector<2x8x8xf32>
    %235 = arith.mulf %234, %128 : vector<2x8x8xf32>
    %236 = vector.broadcast %232 : f32 to vector<2x8x8xf32>
    %237 = arith.addf %236, %235 : vector<2x8x8xf32>
    %c13 = arith.constant 13 : index
    %238 = memref.load %arg7[%c13] : memref<32xf32, #tpu.memory_space<smem>>
    %239 = vector.broadcast %238 : f32 to vector<2x8x8xf32>
    %240 = arith.mulf %239, %129 : vector<2x8x8xf32>
    %241 = arith.addf %237, %240 : vector<2x8x8xf32>
    %c14 = arith.constant 14 : index
    %242 = memref.load %arg7[%c14] : memref<32xf32, #tpu.memory_space<smem>>
    %243 = vector.broadcast %242 : f32 to vector<2x8x8xf32>
    %244 = arith.mulf %243, %130 : vector<2x8x8xf32>
    %245 = arith.addf %241, %244 : vector<2x8x8xf32>
    %c15 = arith.constant 15 : index
    %246 = memref.load %arg7[%c15] : memref<32xf32, #tpu.memory_space<smem>>
    %247 = vector.broadcast %246 : f32 to vector<2x8x8xf32>
    %248 = arith.mulf %247, %131 : vector<2x8x8xf32>
    %249 = arith.addf %245, %248 : vector<2x8x8xf32>
    %250 = vector.extract_strided_slice %147 {offsets = [0, 0, 3], sizes = [2, 8, 1], strides = [1, 1, 1]} : vector<2x8x8xf32> to vector<2x8x1xf32>
    %251 = vector.shape_cast %250 : vector<2x8x1xf32> to vector<2x8xf32>
    %252 = vector.shape_cast %251 : vector<2x8xf32> to vector<2x1x8xf32>
    %253 = vector.broadcast %252 : vector<2x1x8xf32> to vector<2x8x8xf32>
    %254 = arith.addf %249, %253 : vector<2x8x8xf32>
    %255 = vector.extract_strided_slice %147 {offsets = [0, 0, 7], sizes = [2, 8, 1], strides = [1, 1, 1]} : vector<2x8x8xf32> to vector<2x8x1xf32>
    %256 = vector.shape_cast %255 : vector<2x8x1xf32> to vector<2x8xf32>
    %257 = vector.shape_cast %256 : vector<2x8xf32> to vector<2x8x1xf32>
    %258 = vector.broadcast %257 : vector<2x8x1xf32> to vector<2x8x8xf32>
    %259 = arith.addf %254, %258 : vector<2x8x8xf32>
    %260 = arith.addf %175, %203 : vector<2x8x8xf32>
    %261 = arith.addf %260, %231 : vector<2x8x8xf32>
    %262 = arith.addf %261, %259 : vector<2x8x8xf32>
    "tpu.trace_start"() <{level = 10 : i32, message = "bij,bjd->bid"}> : () -> ()
    %cst_51 = arith.constant dense<0.000000e+00> : vector<2x8x128xf32>
    %263 = tpu.matmul %262, %145, %cst_51 {dimension_numbers = #tpu.dot_dimension_numbers<[2], [1], [1], [2], [0, 0, 0, 1, 1, 2], [0], [0]>} : vector<2x8x8xf32>, vector<2x8x128xf32>, vector<2x8x128xf32> -> vector<2x8x128xf32>
    "tpu.trace_stop"() : () -> ()
    %264 = vector.shape_cast %263 : vector<2x8x128xf32> to vector<16x128xf32>
    %cst_52 = arith.constant dense<0.000000e+00> : vector<16x128xf32>
    %265 = tpu.matmul %264, %132, %cst_52 {dimension_numbers = #tpu.dot_dimension_numbers<[1], [0], [0], [1], [0, 0, 1, 1], [], []>} : vector<16x128xf32>, vector<128x128xf32>, vector<16x128xf32> -> vector<16x128xf32>
    %266 = vector.broadcast %133 : vector<1x128xf32> to vector<16x128xf32>
    %267 = arith.addf %265, %266 : vector<16x128xf32>
    %cst_53 = arith.constant 0.000000e+00 : f32
    %268 = vector.broadcast %cst_53 : f32 to vector<16x128xf32>
    %269 = arith.maximumf %267, %268 : vector<16x128xf32>
    %270 = vector.shape_cast %269 : vector<16x128xf32> to vector<2x8x128xf32>
    %cst_54 = arith.constant 0.000000e+00 : f32
    %271 = vector.broadcast %cst_54 : f32 to vector<2x8x128xf32>
    %272 = arith.maximumf %270, %271 : vector<2x8x128xf32>
    %c0_55 = arith.constant 0 : index
    %c0_56 = arith.constant 0 : index
    %c0_57 = arith.constant 0 : index
    %273 = vector.load %arg8[%c0_55, %c0_56, %c0_57] : memref<2x8x128xf32, #tpu.memory_space<vmem>>, vector<2x8x128xf32>
    tpu.vector_store %arg8[%c0_55, %c0_56, %c0_57], %272 {strides = array<i32>} : memref<2x8x128xf32, #tpu.memory_space<vmem>>, vector<2x8x128xf32>,
    return
  }
  func.func @transform_0(%arg0: i32) -> (i32, i32, i32) {
    %c0_i32 = arith.constant 0 : i32
    %c0_i32_0 = arith.constant 0 : i32
    %c0_i32_1 = arith.constant 0 : i32
    return %arg0, %c0_i32, %c0_i32_0 : i32, i32, i32
  }
  func.func @transform_1(%arg0: i32) -> (i32, i32, i32) {
    %c0_i32 = arith.constant 0 : i32
    %c0_i32_0 = arith.constant 0 : i32
    %c0_i32_1 = arith.constant 0 : i32
    return %arg0, %c0_i32, %c0_i32_0 : i32, i32, i32
  }
  func.func @transform_2(%arg0: i32) -> (i32, i32, i32) {
    %c0_i32 = arith.constant 0 : i32
    %c0_i32_0 = arith.constant 0 : i32
    %c0_i32_1 = arith.constant 0 : i32
    return %arg0, %c0_i32, %c0_i32_0 : i32, i32, i32
  }
  func.func @transform_3(%arg0: i32) -> (i32, i32, i32) {
    %c0_i32 = arith.constant 0 : i32
    %c0_i32_0 = arith.constant 0 : i32
    %c0_i32_1 = arith.constant 0 : i32
    return %arg0, %c0_i32, %c0_i32_0 : i32, i32, i32
  }
  func.func @transform_4(%arg0: i32) -> (i32, i32) {
    %c0_i32 = arith.constant 0 : i32
    %c0_i32_0 = arith.constant 0 : i32
    %c0_i32_1 = arith.constant 0 : i32
    return %c0_i32, %c0_i32_0 : i32, i32
  }
  func.func @transform_5(%arg0: i32) -> (i32, i32) {
    %c0_i32 = arith.constant 0 : i32
    %c0_i32_0 = arith.constant 0 : i32
    %c0_i32_1 = arith.constant 0 : i32
    return %c0_i32, %c0_i32_0 : i32, i32
  }
  func.func @transform_6(%arg0: i32) -> i32 {
    %c0_i32 = arith.constant 0 : i32
    %c0_i32_0 = arith.constant 0 : i32
    return %c0_i32 : i32
  }
  func.func @transform_7(%arg0: i32) -> (i32, i32, i32) {
    %c0_i32 = arith.constant 0 : i32
    %c0_i32_0 = arith.constant 0 : i32
    %c0_i32_1 = arith.constant 0 : i32
    return %arg0, %c0_i32, %c0_i32_0 : i32, i32, i32
  }
}

</mosaic_0001>

<bundles_post_ra>
// kernel: tpu_custom_call.1
= control target key start
LH: loop header
LB: loop body
LE: loop exit
PB: predicated region body
PF: predicated region fallthrough
CT: control target
= control target key end

     0   :  { %12 = vsyncpa [#allocation3], 0  ;;  %s3730_s0 = inlined_call_operand.hbm [shape: f32[2,8,32], index: 0, kind: input, shape index: {}]   ;;  %s3731_s1 = inlined_call_operand.vmem [shape: f32[2,1,8], index: 1, kind: input, shape index: {}]   ;;  %s3732_s2 = inlined_call_operand.vmem [shape: f32[2,1,8], index: 2, kind: input, shape index: {}]   ;;  %s3733_s3 = inlined_call_operand.hbm [shape: f32[2,8,8], index: 3, kind: input, shape index: {}]   ;;  %s3734_s4 = inlined_call_operand.hbm [shape: f32[32,128], index: 4, kind: input, shape index: {}]   ;;  %s3735_s5 = inlined_call_operand.hbm [shape: f32[136,640], index: 5, kind: input, shape index: {}]   ;;  %s3736_s6 = inlined_call_operand.vmem [shape: f32[32], index: 6, kind: input, shape index: {}]   ;;  %s3737_s7 = inlined_call_operand.hbm [shape: f32[2,8,128], index: 7, kind: output, shape index: {}]  }
   0x1   :  { %13 = vsyncpa [#allocation7], 0 }
   0x2   :  { %14 = vsyncpa [#allocation10], 0 }
   0x3   :  { %15 = vsyncpa [#allocation5], 0 }
   0x4   :  { %16 = vsyncpa [#allocation4], 0  ;;  %s3077_s24 = smov [#allocation6]   ;;  %s3078_s26 = smov [#allocation2]  }
   0x5   :  { %s38_s25 = sshll.u32 %s3077_s24, 4  ;;  %s22_s27 = sshll.u32 %s3078_s26, 4  ;;  %s39_s25 = int_to_ptr.vmem [resolvable:$true] %s38_s25  ;;  %s3142_s27 = int_to_ptr.vmem [resolvable:$true] %s22_s27 }
   0x6   :  { %s2945_s30 = scalar_lea.hbm %s3733_s3, 256 }
   0x7   :  { %p2946_p0 = scmp.ne.s32.totalorder %s3733_s3, %s2945_s30  ;;  %p2949_p1 = scmp.lt.u32.totalorder %s2945_s30, %s3733_s3 }
   0x9   :  { %p2951_p2 = pnand %p2949_p1, %p2946_p0 }
   0xb   :  { %2954 = shalt.err (!%p2951_p2)
}
   0xc   :  { %s2955_s12 = scalar_lea.vmem %s39_s25, 256  ;;  %p2960_p4 = scmp.lt.s32.totalorder %s39_s25, %s39_s25 }
   0xd   :  { %p2956_p3 = scmp.ne.s32.totalorder %s39_s25, %s2955_s12  ;;  %p2961_p5 = scmp.lt.s32.totalorder %s2955_s12, %s2955_s12 }
   0xf   :  { %p2962_p6 = por %p2961_p5, %p2960_p4 }
  0x11   :  { %p2963_p7 = pnand %p2962_p6, %p2956_p3 }
  0x13   :  { %2966 = shalt.err (!%p2963_p7)
}
  0x14   :  { %s3079_s13 = smov 128   ;;  %s3080_s14 = smov 8  }
  0x15   :  { %44 = dma.hbm_to_vmem [thread:$0]  %s3733_s3, 256, %s39_s25, [#allocation7], %s3079_s13, %s3079_s13, %s3080_s14  }
  0x16   :  { %s2967_s19 = scalar_lea.hbm %s3730_s0, 256 }
  0x17   :  { %p2968_p8 = scmp.ne.s32.totalorder %s3730_s0, %s2967_s19  ;;  %p2971_p9 = scmp.lt.u32.totalorder %s2967_s19, %s3730_s0 }
  0x19   :  { %p2973_p10 = pnand %p2971_p9, %p2968_p8 }
  0x1b   :  { %2976 = shalt.err (!%p2973_p10)
}
  0x1c   :  { %s2977_s24 = scalar_lea.vmem %s3142_s27, 256  ;;  %p2982_p12 = scmp.lt.s32.totalorder %s3142_s27, %s3142_s27 }
  0x1d   :  { %p2978_p11 = scmp.ne.s32.totalorder %s3142_s27, %s2977_s24  ;;  %p2983_p13 = scmp.lt.s32.totalorder %s2977_s24, %s2977_s24 }
  0x1f   :  { %p2984_p0 = por %p2983_p13, %p2982_p12 }
  0x21   :  { %p2985_p1 = pnand %p2984_p0, %p2978_p11 }
  0x23   :  { %2988 = shalt.err (!%p2985_p1)
}
  0x24   :  { %28 = dma.hbm_to_vmem [thread:$0]  %s3730_s0, 256, %s3142_s27, [#allocation3], %s3079_s13, %s3079_s13, %s3080_s14  }
  0x25   :  { %s3081_s26 = smov [#allocation8]   ;;  %s3082_s29 = smov [#allocation9]  }
  0x26   :  { %s50_s28 = sshll.u32 %s3081_s26, 4  ;;  %s62_s30 = sshll.u32 %s3082_s29, 4  ;;  %s51_s28 = int_to_ptr.vmem [resolvable:$true] %s50_s28  ;;  %s3179_s30 = int_to_ptr.vmem [resolvable:$true] %s62_s30 }
  0x27   :  { %s2989_s10 = scalar_lea.hbm %s3734_s4, 512 }
  0x28   :  { %p2990_p2 = scmp.ne.s32.totalorder %s3734_s4, %s2989_s10  ;;  %p2993_p3 = scmp.lt.u32.totalorder %s2989_s10, %s3734_s4 }
  0x2a   :  { %p2995_p4 = pnand %p2993_p3, %p2990_p2 }
  0x2c   :  { %2998 = shalt.err (!%p2995_p4)
}
  0x2d   :  { %s2999_s0 = scalar_lea.vmem %s51_s28, 512  ;;  %p3004_p6 = scmp.lt.s32.totalorder %s51_s28, %s51_s28 }
  0x2e   :  { %p3000_p5 = scmp.ne.s32.totalorder %s51_s28, %s2999_s0  ;;  %p3005_p7 = scmp.lt.s32.totalorder %s2999_s0, %s2999_s0 }
  0x30   :  { %p3006_p8 = por %p3005_p7, %p3004_p6 }
  0x32   :  { %p3007_p9 = pnand %p3006_p8, %p3000_p5 }
  0x34   :  { %3010 = shalt.err (!%p3007_p9)
}
  0x35   :  { %56 = dma.hbm_to_vmem [thread:$0]  %s3734_s4, 512, %s51_s28, [#allocation7], %s3079_s13, %s3079_s13, %s3080_s14  }
  0x36   :  { %s3011_s20 = scalar_lea.hbm %s3735_s5, 10880 }
  0x37   :  { %p3012_p10 = scmp.ne.s32.totalorder %s3735_s5, %s3011_s20  ;;  %p3015_p11 = scmp.lt.u32.totalorder %s3011_s20, %s3735_s5 }
  0x39   :  { %p3017_p12 = pnand %p3015_p11, %p3012_p10 }
  0x3b   :  { %3020 = shalt.err (!%p3017_p12)
}
  0x3c   :  { %s3021_s3 = scalar_lea.vmem %s3179_s30, 10880  ;;  %p3026_p0 = scmp.lt.s32.totalorder %s3179_s30, %s3179_s30 }
  0x3d   :  { %p3022_p13 = scmp.ne.s32.totalorder %s3179_s30, %s3021_s3  ;;  %p3027_p1 = scmp.lt.s32.totalorder %s3021_s3, %s3021_s3 }
  0x3f   :  { %p3028_p2 = por %p3027_p1, %p3026_p0 }
  0x41   :  { %p3029_p3 = pnand %p3028_p2, %p3022_p13 }
  0x43   :  { %3032 = shalt.err (!%p3029_p3)
}
  0x44   :  { %s3083_s4 = smov 640   ;;  %s3084_s25 = smov 40  }
  0x45   :  { %68 = dma.hbm_to_vmem [thread:$0]  %s3735_s5, 10880, %s3179_s30, [#allocation10], %s3083_s4, %s3083_s4, %s3084_s25  }
  0x46   :  { %s75_s9 = sshll.u32 %s3736_s6, 4  ;;  %s76_s9 = int_to_ptr.vmem [resolvable:$true] %s75_s9 }
  0x47   :  { %s3033_s10 = scalar_lea.vmem %s76_s9, 16  ;;  %p3038_p5 = scmp.lt.s32.totalorder %s76_s9, %s76_s9 }
  0x48   :  { %p3034_p4 = scmp.ne.s32.totalorder %s76_s9, %s3033_s10  ;;  %p3039_p6 = scmp.lt.s32.totalorder %s3033_s10, %s3033_s10 }
  0x4a   :  { %p3040_p7 = por %p3039_p6, %p3038_p5 }
  0x4c   :  { %p3041_p8 = pnand %p3040_p7, %p3034_p4 }
  0x4e   :  { %3044 = shalt.err (!%p3041_p8)
}
  0x4f   :  { %s3085_s11 = smov [#allocation11]  }
  0x50   :  { %78 = dma.vmem_to_smem %s76_s9, 16, %s3085_s11, [#allocation5]  }
  0x51   :  { %3067 = dma.done.wait [#allocation3], 256  }
  0x52   :  { %3068 = vsyncadd [#allocation3], 4294967040 }
  0x53   :  { %3069 = dma.done.wait [#allocation7], 768  }
  0x54   :  { %3070 = vsyncadd [#allocation7], 4294966528 }
  0x55   :  { %3071 = dma.done.wait [#allocation10], 10880  }
  0x56   :  { %3072 = vsyncadd [#allocation10], 4294956416 }
  0x57   :  { %3073 = dma.done.wait [#allocation5], 16  }
  0x58   :  { %3074 = vsyncadd [#allocation5], 4294967280 }
  0x59   :  { %94 = sfence }
  0x5a   :  { %v95_v0 = vld [vmem:[#allocation2] sm:$0xff]  ;;  %vm97_vm0 = vcmask 261120   ;;  %v96_v1 = vld [vmem:[#allocation2 + $0x8] sm:$0xff]  ;;  %v144_v16 = vld [vmem:[#allocation8 + $0x10] sm:$0xff]  ;;  %v235_v22 = vlaneseq  ;;  %v3086_v23 = vmov 1966171168  }
  0x5b   :  { %v98_v2 = vsel %vm97_vm0, %v95_v0, 0.0  ;;  %v101_v3 = vsel %vm97_vm0, %v96_v1, 0.0  ;;  %v142_v14 = vld [vmem:[#allocation8] sm:$0xff]  ;;  %v143_v15 = vld [vmem:[#allocation8 + $0x8] sm:$0xff]  ;;  %v145_v18 = vld [vmem:[#allocation8 + $0x18] sm:$0xff]  ;;  %v233_v24 = vunpack.c.l.s4 %v3086_v23  ;;  %vm247_vm1 = vcmask 58368  }
  0x5c   :  { %99 = vadd.xlane.f32.xlu0 %v98_v2  ;;  %v2684_v17 = vpack.c.bf16 %v143_v15, %v142_v14  ;;  %v2688_v19 = vpack.c.bf16 %v145_v18, %v144_v16  ;;  %v227_v20 = vld [vmem:[%s3731_s1] sm:$0x1]  ;;  %v228_v21 = vld [vmem:[%s3731_s1 + $0x1] sm:$0x1]  ;;  %v405_v25 = vld [vmem:[#allocation9 + $0x8] sm:$0xff]  ;;  %v3235_v27 = vshrl.u32 %v235_v22, 7 }
  0x5d   :  { %v407_v26 = vld [vmem:[#allocation9 + $0x30] sm:$0xff]  ;;  %v231_v29 = vcombine.low %v227_v20, %v228_v21  ;;  %v234_v30 = vunpack.c.0.s8 %v233_v24  ;;  %v288_v38 = vld [vmem:[#allocation9 + $0x38] sm:$0xff]  ;;  %v3087_v39 = vmov 0.0|0.0   ;;  %v289_v41 = vld [vmem:[#allocation9 + $0x60] sm:$0xff]  ;;  %vm3089_vm6 = vmmov 0   ;;  %s3090_s1 = smov 96  }
  0x5e   :  { %2685 = vmatprep.subr.bf16.mxu0 %v2684_v17  ;;  %v2716_v28 = vpack.c.bf16 %v407_v26, %v405_v25  ;;  %v3238_v31 = vsub.s32 0, %v3235_v27  ;;  %v287_v37 = vld [vmem:[#allocation9 + $0x10] sm:$0xff]  ;;  %2692 = vmatprep.subr.bf16.mxu1 %v3087_v39  ;;  %v290_v42 = vld [vmem:[#allocation9 + $0x88] sm:$0xff]  ;;  %v292_v45 = vld [vmem:[#allocation9 + $0xd8] sm:$0xff]  ;;  %vm307_vm7 = vcmask 1041409   ;;  %s3091_s15 = smov 64  }
  0x5f   :  { %2687 = vmatpush3.bf16.msra.mxu0 %v2684_v17  ;;  %v3241_v32 = vsub.s32 %v234_v30, %v3235_v27  ;;  %v2693_v40 = vpack.c.bf16 %v288_v38, %v287_v37  ;;  %v2696_v43 = vpack.c.bf16 %v290_v42, %v289_v41  ;;  %v291_v44 = vld [vmem:[#allocation9 + $0xb0] sm:$0xff]  ;;  %v404_v2 = vld [vmem:[#allocation9] sm:$0xff]  ;;  %v413_v14 = vld [vmem:[#allocation9 + $0xa8] sm:$0xff]  ;;  %s3092_s16 = smov 32   ;;  %s2332_s0 = sld [smem:[#allocation11 + $0x14]]  ;;  %vm1385_vm12 = vcmask 64512  }
  0x60   :  { %102 = vadd.xlane.f32.xlu0 %v101_v3  ;;  %2689 = vmatprep.subr.bf16.mxu0 %v2688_v19  ;;  %v261_v33 = vrot.slane %v228_v21, %v3238_v31  ;;  %v2699_v46 = vpack.c.bf16 %v292_v45, %v291_v44  ;;  %v254_v47 = vrot.slane %v227_v20, %v3238_v31  ;;  %v406_v3 = vld [vmem:[#allocation9 + $0x28] sm:$0xff]  ;;  %v415_v15 = vld [vmem:[#allocation9 + $0xd0] sm:$0xff]  ;;  %v412_v17 = vld [vmem:[#allocation9 + $0xa0] sm:$0xff]  ;;  %s3512_s20 = sld [smem:[#allocation11 + $0x8]]  ;;  %s3516_s22 = sld [smem:[#allocation11 + $0xc]] }
  0x61   :  { %v238_v34 = vrot.slane %v231_v29, %v3241_v32  ;;  %2694 = vmatpush3.bf16.msra.mxu1 %v2693_v40  ;;  %v414_v18 = vld [vmem:[#allocation9 + $0xc8] sm:$0xff]  ;;  %v419_v20 = vld [vmem:[#allocation9 + $0x120] sm:$0xff]  ;;  %v418_v24 = vld [vmem:[#allocation9 + $0x118] sm:$0xff]  ;;  %s3514_s21 = sld [smem:[#allocation11]]  ;;  %s3518_s23 = sld [smem:[#allocation11 + $0x11]] }
  0x62   :  { %2695 = vmatprep.subr.bf16.mxu1 %v3087_v39  ;;  %v2726_v21 = vpack.c.bf16 %v414_v18, %v412_v17  ;;  %v421_v25 = vld [vmem:[#allocation9 + $0x148] sm:$0xff]  ;;  %v423_v26 = vld [vmem:[#allocation9 + $0x170] sm:$0xff]  ;;  %v420_v30 = vld [vmem:[#allocation9 + $0x140] sm:$0xff]  ;;  %s3520_s24 = sld [smem:[#allocation11 + $0x12]]  ;;  %s3522_s3 = sld [smem:[#allocation11 + $0x10]] }
  0x63   :  { %2691 = vmatpush3.bf16.msra.mxu0 %v2688_v19  ;;  %v245_v35 = vrot.slane %v238_v34, %v3241_v32  ;;  %v417_v19 = vld [vmem:[#allocation9 + $0xf8] sm:$0xff]  ;;  %v2732_v29 = vpack.c.bf16 %v423_v26, %v421_v25  ;;  %v424_v38 = vld [vmem:[#allocation9 + $0x190] sm:$0xff]  ;;  %v429_v41 = vld [vmem:[#allocation9 + $0x1e8] sm:$0xff]  ;;  %s3524_s4 = sld [smem:[#allocation11 + $0x13]]  ;;  %s3526_s25 = sld [smem:[#allocation11 + $0x5]] }
  0x64   :  { %2717 = vmatprep.subr.bf16.mxu0 %v2716_v28  ;;  %v2728_v23 = vpack.c.bf16 %v419_v20, %v417_v19  ;;  %v425_v34 = vld [vmem:[#allocation9 + $0x198] sm:$0xff]  ;;  %v431_v42 = vld [vmem:[#allocation9 + $0x210] sm:$0xff]  ;;  %v428_v45 = vld [vmem:[#allocation9 + $0x1e0] sm:$0xff]  ;;  %s3528_s26 = sld [smem:[#allocation11 + $0x9]]  ;;  %s3532_s29 = sld [smem:[#allocation11 + $0xd]] }
  0x65   :  { %v248_v36 = vsel %vm247_vm1, %v245_v35, 0.0  ;;  %2697 = vmatpush3.bf16.msra.mxu1 %v2696_v43  ;;  %v427_v35 = vld [vmem:[#allocation9 + $0x1c0] sm:$0xff]  ;;  %v426_v40 = vld [vmem:[#allocation9 + $0x1b8] sm:$0xff]  ;;  %v2740_v44 = vpack.c.bf16 %v431_v42, %v429_v41  ;;  %s3530_s28 = sld [smem:[#allocation11 + $0x1]]  ;;  %s3534_s8 = sld [smem:[#allocation11 + $0x6]] }
  0x66   :  { %249 = vadd.xlane.f32.xlu0 %v248_v36  ;;  %2698 = vmatprep.subr.bf16.mxu1 %v3087_v39  ;;  %v2736_v37 = vpack.c.bf16 %v427_v35, %v425_v34  ;;  %v2738_v43 = vpack.c.bf16 %v426_v40, %v424_v38  ;;  %v437_v38 = vld [vmem:[#allocation9 + $0x280] ss:$8 sm:$0x3]  ;;  %v445_v40 = vsub.s32 1, %v3235_v27  ;;  %s3536_s9 = sld [smem:[#allocation11 + $0xa]]  ;;  %s3540_s11 = sld [smem:[#allocation11 + $0xe]] }
  0x67   :  { %v442_v41 = vrot.slane %v437_v38, %v3238_v31  ;;  %s3538_s10 = sld [smem:[#allocation11 + $0x2]]  ;;  %s3542_s5 = sld [smem:[#allocation11 + $0x7]] }
  0x68   :  { %v446_v42 = vrot.slane %v437_v38, %v445_v40  ;;  %s3544_s6 = sld [smem:[#allocation11 + $0xb]]  ;;  %s3549_s12 = sld [smem:[#allocation11 + $0xf]] }
  0x69   :  { %2700 = vmatpush3.bf16.msra.mxu1 %v2699_v46  ;;  %v430_v46 = vld [vmem:[#allocation9 + $0x208] sm:$0xff]  ;;  %s3547_s30 = sld [smem:[#allocation11 + $0x3]] }
  0x6a   :  { %2701 = vmatprep.subr.bf16.mxu1 %v3087_v39 }
  0x7c   :  { %256 = vbcast.lane.b32.xlu0 %v254_v47, 256  ;;  %v2742_v47 = vpack.c.bf16 %v430_v46, %v428_v45 }
  0xe9   :  { %v100_v4 = vpop.xlane.xlu0 %99 }
  0xea   :  { %v105_v5 = vmul.f32 0.03125, %v100_v4  ;;  %v409_v4 = vld [vmem:[#allocation9 + $0x58] sm:$0xff] }
  0xec   :  { %v3218_v6 = vsub.f32 %v95_v0, %v105_v5  ;;  %v411_v5 = vld [vmem:[#allocation9 + $0x80] sm:$0xff] }
  0xed   :  { %v103_v7 = vpop.xlane.xlu0 %102 }
  0xee   :  { %v106_v8 = vmul.f32 0.03125, %v103_v7  ;;  %v109_v9 = vmul.f32 %v3218_v6, %v3218_v6 }
  0xf0   :  { %v3222_v10 = vsub.f32 %v96_v1, %v106_v8  ;;  %v111_v11 = vsel %vm97_vm0, %v109_v9, 0.0  ;;  %v2718_v8 = vpack.c.bf16 %v406_v3, %v404_v2  ;;  %v301_v3 = vld [vmem:[#allocation9 + $0x240] sm:$0xff] }
  0xf1   :  { %112 = vadd.xlane.f32.xlu1 %v111_v11  ;;  %v2720_v11 = vpack.c.bf16 %v411_v5, %v409_v4  ;;  %v302_v4 = vld [vmem:[#allocation9 + $0x268] sm:$0xff] }
  0xf2   :  { %v110_v12 = vmul.f32 %v3222_v10, %v3222_v10  ;;  %v2714_v5 = vpack.c.bf16 %v302_v4, %v301_v3 }
  0xf4   :  { %v114_v13 = vsel %vm97_vm0, %v110_v12, 0.0  ;;  %v408_v12 = vld [vmem:[#allocation9 + $0x50] sm:$0xff] }
  0xf5   :  { %115 = vadd.xlane.f32.xlu1 %v114_v13  ;;  %v410_v13 = vld [vmem:[#allocation9 + $0x78] sm:$0xff] }
  0xf6   :  { %v2722_v16 = vpack.c.bf16 %v410_v13, %v408_v12 }
 0x106   :  { %263 = vbcast.lane.b32.xlu1 %v261_v33, 256  ;;  %v422_v33 = vld [vmem:[#allocation9 + $0x168] sm:$0xff] }
 0x107   :  { %v2734_v36 = vpack.c.bf16 %v422_v33, %v420_v30 }
 0x17e   :  { %v113_v48 = vpop.xlane.xlu1 %112 }
 0x17f   :  { %v117_v49 = vmul.f32 0.032258064, %v113_v48  ;;  %v433_v48 = vld [vmem:[#allocation9 + $0x238] sm:$0xff] }
 0x181   :  { %2885 = vrsqrt.f32 %v117_v49  ;;  %vm121_vm2 = vcmp.eq.f32.partialorder %v117_v49, inf  ;;  %v124_v54 = vand.u32 2147483648, %v117_v49  ;;  %vm123_vm3 = vcmp.eq.f32.partialorder %v117_v49, 0.0 }
 0x182   :  { %v116_v50 = vpop.xlane.xlu1 %115 }
 0x183   :  { %v118_v51 = vmul.f32 0.032258064, %v116_v50 }
 0x185   :  { %2887 = vrsqrt.f32 %v118_v51  ;;  %vm128_vm4 = vcmp.eq.f32.partialorder %v118_v51, inf  ;;  %v131_v60 = vand.u32 2147483648, %v118_v51  ;;  %vm130_vm5 = vcmp.eq.f32.partialorder %v118_v51, 0.0 }
 0x186   :  { %v264_v12 = vpop.permute.xlu1 %263 }
 0x18b   :  { %v2886_v52 = vpop.eup %2885 }
 0x18c   :  { %v120_v53 = vmul.f32 %v2886_v52, %v117_v49  ;;  %v434_v52 = vld [vmem:[#allocation9 + $0x258] sm:$0xff] }
 0x18e   :  { %v122_v55 = vsel %vm121_vm2, %v117_v49, %v120_v53  ;;  %v435_v49 = vld [vmem:[#allocation9 + $0x260] sm:$0xff] }
 0x18f   :  { %v2888_v56 = vpop.eup %2887  ;;  %v125_v57 = vsel %vm123_vm3, %v124_v54, %v122_v55  ;;  %v2744_v50 = vpack.c.bf16 %v435_v49, %v433_v48  ;;  %v293_v54 = vld [vmem:[#allocation9 + $0x100] sm:$0xff]  ;;  %v294_v55 = vld [vmem:[#allocation9 + $0x128] sm:$0xff] }
 0x190   :  { %v127_v58 = vmul.f32 %v2888_v56, %v118_v51  ;;  %v133_v59 = vadd.f32 1e-06, %v125_v57  ;;  %v2702_v56 = vpack.c.bf16 %v294_v55, %v293_v54  ;;  %v3088_v57 = vmov 0.0  }
 0x191   :  { %2516 = vmatprep.mubr.msk.f32.mxu1 %vm3089_vm6, %v3088_v57 }
 0x192   :  { %v129_v61 = vsel %vm128_vm4, %v118_v51, %v127_v58  ;;  %2889 = vrcp.f32 %v133_v59  ;;  %v432_v51 = vld [vmem:[#allocation9 + $0x230] sm:$0xff]  ;;  %2703 = vmatpush3.bf16.msra.mxu1 %v2702_v56  ;;  %v296_v59 = vld [vmem:[#allocation9 + $0x178] sm:$0xff] }
 0x193   :  { %v132_v62 = vsel %vm130_vm5, %v131_v60, %v129_v61  ;;  %v2746_v53 = vpack.c.bf16 %v434_v52, %v432_v51  ;;  %2704 = vmatprep.subr.bf16.mxu1 %v3087_v39  ;;  %v295_v58 = vld [vmem:[#allocation9 + $0x150] sm:$0xff]  ;;  %v297_v61 = vld [vmem:[#allocation9 + $0x1a0] sm:$0xff] }
 0x194   :  { %v134_v63 = vadd.f32 1e-06, %v132_v62  ;;  %v2705_v60 = vpack.c.bf16 %v296_v59, %v295_v58  ;;  %v298_v62 = vld [vmem:[#allocation9 + $0x1c8] sm:$0xff]  ;;  %v303_v51 = vld [vmem:[#allocation9 + $0x290] ss:$0 sm:$0xff] }
 0x196   :  { %2891 = vrcp.f32 %v134_v63  ;;  %2706 = vmatpush3.bf16.msra.mxu1 %v2705_v60  ;;  %v2708_v63 = vpack.c.bf16 %v298_v62, %v297_v61 }
 0x197   :  { %2707 = vmatprep.subr.bf16.mxu1 %v3087_v39 }
 0x19a   :  { %2709 = vmatpush3.bf16.msra.mxu1 %v2708_v63 }
 0x19b   :  { %2710 = vmatprep.subr.bf16.mxu1 %v3087_v39 }
 0x19c   :  { %v2890_v0 = vpop.eup %2889 }
 0x19d   :  { %v139_v1 = vmul.f32 %v2890_v0, %v3218_v6  ;;  %v2724_v6 = vpack.c.bf16 %v415_v15, %v413_v14  ;;  %v299_v0 = vld [vmem:[#allocation9 + $0x1f0] sm:$0xff] }
 0x19f   :  { %2481 = vmatprep.mubr.msk.f32.mxu0 %vm97_vm0, %v139_v1  ;;  %v300_v1 = vld [vmem:[#allocation9 + $0x218] sm:$0xff] }
 0x1a0   :  { %v2892_v7 = vpop.eup %2891  ;;  %v2711_v2 = vpack.c.bf16 %v300_v1, %v299_v0 }
 0x1a1   :  { %v140_v9 = vmul.f32 %v2892_v7, %v3222_v10  ;;  %v416_v10 = vld [vmem:[#allocation9 + $0xf0] sm:$0xff]  ;;  %v250_v7 = vpop.xlane.xlu0 %249 }
 0x1a2   :  { %v2730_v28 = vpack.c.bf16 %v418_v24, %v416_v10  ;;  %2712 = vmatpush3.bf16.msra.mxu1 %v2711_v2 }
 0x1a3   :  { %2482 = vmatmul.mubr.msk.f32.vlgmr.msra.gmra.mrb[0].mxu0 %vm97_vm0, %v140_v9  ;;  %2713 = vmatprep.subr.bf16.mxu1 %v3087_v39  ;;  %v280_v9 = vrot.slane %v250_v7, 1 }
 0x1a4   :  { %2719 = vmatpush1.bf16.msra.mxu0 %v2718_v8  ;;  %513 = vmatprep.mubr.f32.mxu0 %v3088_v57  ;;  %v141_v8 = vld [vmem:[#allocation9 + $0x281] ss:$0 sm:$0xff] }
 0x1a5   :  { %2721 = vmatprep.subr.bf16.mxu0 %v2720_v11  ;;  %v257_v15 = vpop.permute.xlu0 %256  ;;  %2893 = vrcp.f32 %v280_v9 }
 0x1a6   :  { %2715 = vmatpush3.bf16.msra.mxu1 %v2714_v5  ;;  %2895 = vrcp.f32 %v250_v7 }
 0x1a7   :  { %2539 = vmatprep.subr.mxu1 %v3088_v57 }
 0x1a8   :  { %2723 = vmatpush1.bf16.msra.mxu0 %v2722_v16 }
 0x1a9   :  { %2725 = vmatprep.subr.bf16.mxu0 %v2724_v6 }
 0x1ac   :  { %2727 = vmatpush1.bf16.msra.mxu0 %v2726_v21 }
 0x1ad   :  { %2729 = vmatprep.subr.bf16.mxu0 %v2728_v23 }
 0x1af   :  { %v2894_v26 = vpop.eup %2893 }
 0x1b0   :  { %2731 = vmatpush1.bf16.msra.mxu0 %v2730_v28  ;;  %v2896_v33 = vpop.eup %2895 }
 0x1b1   :  { %2733 = vmatprep.subr.bf16.mxu0 %v2732_v29 }
 0x1b4   :  { %2735 = vmatpush1.bf16.msra.mxu0 %v2734_v36 }
 0x1b5   :  { %2737 = vmatprep.subr.bf16.mxu0 %v2736_v37 }
 0x1b8   :  { %2739 = vmatpush1.bf16.msra.mxu0 %v2738_v43 }
 0x1b9   :  { %2741 = vmatprep.subr.bf16.mxu0 %v2740_v44 }
 0x1bc   :  { %2743 = vmatpush1.bf16.msra.mxu0 %v2742_v47 }
 0x1bd   :  { %2745 = vmatprep.subr.bf16.mxu0 %v2744_v50 }
 0x1c0   :  { %2747 = vmatpush1.bf16.msra.mxu0 %v2746_v53 }
 0x1c1   :  { %2519 = vmatprep.subr.mxu0 %v3088_v57 }
 0x276   :  { %v2483_v11 = vpop.f32.mrb[0].mxu0 }
 0x277   :  { %v3264_v13 = vadd.f32 %v2483_v11, %v141_v8  ;;  %v218_v14 = vpop.f32.mrb[1].mxu0 }
 0x278   :  { %v3266_v39 = vadd.f32 %v218_v14, %v141_v8 }
 0x279   :  { %v266_v16 = vmul.f32 %v264_v12, %v3264_v13 }
 0x27a   :  { %v265_v6 = vmul.f32 %v257_v15, %v3266_v39  ;;  %514 = vmatmul.mubr.f32.vlgmr.msra.gmra.mrb[2].mxu0 %v3266_v39 }
 0x27b   :  { %v273_v17 = vrot.slane %v266_v16, 4  ;;  %519 = vmatprep.mubr.f32.mxu0 %v3088_v57 }
 0x27c   :  { %v267_v18 = vrot.slane %v265_v6, 4 }
 0x27d   :  { %v274_v19 = vadd.f32 %v273_v17, %v266_v16 }
 0x27e   :  { %v268_v20 = vadd.f32 %v267_v18, %v265_v6  ;;  %520 = vmatmul.mubr.f32.gmra.mrb[4].mxu0 %v3264_v13 }
 0x27f   :  { %v275_v21 = vrot.slane %v274_v19, 2  ;;  %2521 = vmatprep.mubr.msk.f32.mxu0 %vm3089_vm6, %v3088_v57 }
 0x280   :  { %v269_v23 = vrot.slane %v268_v20, 2 }
 0x281   :  { %v276_v10 = vadd.f32 %v275_v21, %v274_v19 }
 0x282   :  { %v270_v24 = vadd.f32 %v269_v23, %v268_v20 }
 0x283   :  { %v277_v25 = vrot.slane %v276_v10, 1 }
 0x284   :  { %v271_v28 = vrot.slane %v270_v24, 1 }
 0x285   :  { %v278_v29 = vadd.f32 %v277_v25, %v276_v10  ;;  %v3093_v25 = vmov 0  }
 0x286   :  { %v272_v30 = vadd.f32 %v271_v28, %v270_v24  ;;  %2869 = vset.pattern.permute.xlu1 %v3093_v25 }
 0x287   :  { %v286_v34 = vmul.f32 %v2894_v26, %v278_v29 }
 0x288   :  { %v284_v35 = vmul.f32 %v2896_v33, %v272_v30 }
 0x289   :  { %v306_v36 = vrot.slane %v286_v34, 7 }
 0x28b   :  { %v308_v37 = vsel %vm307_vm7, %v306_v36, %v284_v35 }
 0x28c   :  { %2517 = vmatmul.mubr.f32.vlgmr.msra.gmra.mrb[0].mxu1 %v308_v37 }
 0x28d   :  { %2541 = vmatprep.mubr.msk.f32.mxu1 %vm3089_vm6, %v3088_v57 }
 0x34d   :  { %v515_v43 = vpop.f32.mrb[2].mxu0 }
 0x34e   :  { %v516_v44 = vadd.f32 %v515_v43, %v442_v41  ;;  %v517_v45 = vpop.f32.mrb[3].mxu0 }
 0x34f   :  { %v3279_v46 = vadd.f32 %v517_v45, %v446_v42 }
 0x350   :  { %759 = vrot.lane.b32.xlu1 %v516_v44, %s3090_s1 }
 0x351   :  { %v521_v47 = vpop.f32.mrb[4].mxu0  ;;  %2520 = vmatpush3.xpose.msk.msra.mxu0 %vm97_vm0, %v3279_v46 }
 0x352   :  { %v522_v48 = vadd.f32 %v521_v47, %v442_v41  ;;  %v523_v49 = vpop.f32.mrb[5].mxu0  ;;  %2524 = vmatprep.subr.mxu0 %v3088_v57 }
 0x353   :  { %v3285_v50 = vadd.f32 %v523_v49, %v446_v42 }
 0x354   :  { %849 = vrot.lane.b32.xlu0 %v522_v48, %s3090_s1  ;;  %761 = vrot.lane.b32.xlu1 %v3279_v46, %s3090_s1 }
 0x355   :  { %2522 = vmatmul.mubr.msk.f32.vlgmr.msra.gmra.mrb[6].mxu0 %vm97_vm0, %v516_v44 }
 0x356   :  { %2525 = vmatpush3.xpose.msk.msra.mxu0 %vm97_vm0, %v3285_v50  ;;  %2526 = vmatprep.mubr.msk.f32.mxu0 %vm3089_vm6, %v3088_v57 }
 0x357   :  { %2529 = vmatprep.subr.mxu0 %v3088_v57 }
 0x358   :  { %1055 = vrot.lane.b32.xlu0 %v522_v48, %s3091_s15  ;;  %967 = vrot.lane.b32.xlu1 %v3279_v46, %s3091_s15 }
 0x359   :  { %2527 = vmatmul.mubr.msk.f32.vlgmr.msra.gmra.mrb[8].mxu0 %vm97_vm0, %v522_v48 }
 0x35a   :  { %2531 = vmatprep.mubr.msk.f32.mxu0 %vm3089_vm6, %v3088_v57 }
 0x35c   :  { %1057 = vrot.lane.b32.xlu0 %v3285_v50, %s3091_s15  ;;  %851 = vrot.lane.b32.xlu1 %v3285_v50, %s3090_s1 }
 0x35f   :  { %v376_v52 = vpop.f32.mrb[0].mxu1 }
 0x360   :  { %v377_v53 = vadd.f32 %v376_v52, %v303_v51  ;;  %1263 = vrot.lane.b32.xlu0 %v3285_v50, %s3092_s16  ;;  %965 = vrot.lane.b32.xlu1 %v516_v44, %s3091_s15  ;;  %v2518_v54 = vpop.f32.mrb[1].mxu1  ;;  %v551_v51 = vand.u32 127, %v235_v22  ;;  %v1351_v52 = vld [vmem:[%s3732_s2] sm:$0x1] }
 0x361   :  { %vm1355_vm8 = vcmp.eq.f32.partialorder %v1351_v52, 0.0 }
 0x362   :  { %v387_v55 = vrot.slane %v377_v53, %v3241_v32  ;;  %v1352_v53 = vld [vmem:[%s3732_s2 + $0x1] sm:$0x1]  ;;  %s3510_s2 = sld [smem:[#allocation11 + $0x4]] }
 0x363   :  { %vm1356_vm9 = vcmp.eq.f32.partialorder %v1352_v53, 0.0 }
 0x364   :  { %v388_v56 = vcombine.high %v387_v55, %v387_v55  ;;  %1261 = vrot.lane.b32.xlu0 %v522_v48, %s3092_s16  ;;  %1173 = vrot.lane.b32.xlu1 %v3279_v46, %s3092_s16  ;;  %v395_v58 = vrot.slane %v387_v55, %v3241_v32  ;;  %v1358_v22 = vsel %vm1356_vm9, 1, %v3093_v25 }
 0x366   :  { %v402_v59 = vrot.slane %v388_v56, %v3241_v32  ;;  %v3320_v61 = vrot.slane %v395_v58, %v3238_v31  ;;  %v3403_v56 = vsub.s32 %v551_v51, %v3235_v27 }
 0x368   :  { %1171 = vrot.lane.b32.xlu1 %v516_v44, %s3092_s16  ;;  %v3317_v60 = vrot.slane %v402_v59, %v3238_v31  ;;  %v536_v10 = vmul.f32 %v3320_v61, %v3279_v46  ;;  %v1357_v59 = vsel %vm1355_vm8, 1, %v3093_v25 }
 0x36a   :  { %735 = vrot.lane.b32.xlu0 %v3317_v60, %s3092_s16  ;;  %v537_v21 = vmul.f32 %v3317_v60, %v3285_v50  ;;  %v538_v24 = vsel %vm97_vm0, %v536_v10, 0.0 }
 0x36c   :  { %733 = vrot.lane.b32.xlu1 %v3320_v61, %s3092_s16  ;;  %v541_v23 = vsel %vm97_vm0, %v537_v21, 0.0 }
 0x36e   :  { %941 = vrot.lane.b32.xlu0 %v3317_v60, %s3091_s15 }
 0x370   :  { %939 = vrot.lane.b32.xlu1 %v3320_v61, %s3091_s15 }
 0x372   :  { %1147 = vrot.lane.b32.xlu0 %v3317_v60, %s3090_s1 }
 0x374   :  { %1145 = vrot.lane.b32.xlu1 %v3320_v61, %s3090_s1 }
 0x3c2   :  { %v760_v32 = vpop.permute.xlu1 %759 }
 0x3c6   :  { %v762_v62 = vpop.permute.xlu1 %761  ;;  %v850_v63 = vpop.permute.xlu0 %849 }
 0x3c7   :  { %2530 = vmatpush3.xpose.msk.msra.mxu0 %vm97_vm0, %v762_v62  ;;  %v1366_v62 = vrot.slane %v1358_v22, %v3238_v31 }
 0x3c8   :  { %2534 = vmatprep.subr.mxu0 %v3088_v57 }
 0x3c9   :  { %vm3415_vm11 = vcmp.eq.s32.totalorder %v1366_v62, 1 }
 0x3ca   :  { %2532 = vmatmul.mubr.msk.f32.vlgmr.msra.gmra.mrb[10].mxu0 %vm97_vm0, %v760_v32  ;;  %v968_v0 = vpop.permute.xlu1 %967  ;;  %v1056_v1 = vpop.permute.xlu0 %1055  ;;  %v1362_v32 = vrot.slane %v1357_v59, %v3238_v31 }
 0x3cb   :  { %2540 = vmatpush3.xpose.msk.msra.mxu1 %vm97_vm0, %v968_v0  ;;  %2536 = vmatprep.mubr.msk.f32.mxu0 %vm3089_vm6, %v3088_v57 }
 0x3cc   :  { %2549 = vmatprep.subr.mxu1 %v3088_v57  ;;  %vm3411_vm10 = vcmp.eq.s32.totalorder %v1362_v32, 1 }
 0x3ce   :  { %v852_v2 = vpop.permute.xlu1 %851  ;;  %v1058_v3 = vpop.permute.xlu0 %1057 }
 0x3cf   :  { %2535 = vmatpush3.xpose.msk.msra.mxu0 %vm97_vm0, %v852_v2 }
 0x3d0   :  { %2544 = vmatprep.subr.mxu0 %v3088_v57 }
 0x3d2   :  { %v966_v4 = vpop.permute.xlu1 %965  ;;  %2537 = vmatmul.mubr.msk.f32.vlgmr.msra.gmra.mrb[12].mxu0 %vm97_vm0, %v850_v63  ;;  %v1264_v5 = vpop.permute.xlu0 %1263 }
 0x3d3   :  { %2542 = vmatmul.mubr.msk.f32.vlgmr.msra.gmra.mrb[2].mxu1 %vm97_vm0, %v966_v4  ;;  %2545 = vmatpush3.xpose.msk.msra.mxu0 %vm97_vm0, %v1058_v3 }
 0x3d4   :  { %2546 = vmatprep.mubr.msk.f32.mxu0 %vm3089_vm6, %v3088_v57  ;;  %2554 = vmatprep.subr.mxu0 %v3088_v57 }
 0x3d5   :  { %2551 = vmatprep.mubr.msk.f32.mxu1 %vm3089_vm6, %v3088_v57 }
 0x3d6   :  { %v1174_v7 = vpop.permute.xlu1 %1173  ;;  %2547 = vmatmul.mubr.msk.f32.vlgmr.msra.gmra.mrb[14].mxu0 %vm97_vm0, %v1056_v1  ;;  %v1262_v8 = vpop.permute.xlu0 %1261 }
 0x3d7   :  { %2550 = vmatpush3.xpose.msk.msra.mxu1 %vm97_vm0, %v1174_v7  ;;  %2555 = vmatpush3.xpose.msk.msra.mxu0 %vm97_vm0, %v1264_v5 }
 0x3d8   :  { %2556 = vmatprep.mubr.msk.f32.mxu0 %vm3089_vm6, %v3088_v57  ;;  %2559 = vmatprep.subr.mxu1 %v3088_v57 }
 0x3d9   :  { %2564 = vmatprep.subr.mxu0 %v3088_v57 }
 0x3da   :  { %v1172_v9 = vpop.permute.xlu1 %1171  ;;  %2557 = vmatmul.mubr.msk.f32.vlgmr.msra.gmra.mrb[16].mxu0 %vm97_vm0, %v1262_v8 }
 0x3db   :  { %2552 = vmatmul.mubr.msk.f32.vlgmr.msra.gmra.mrb[4].mxu1 %vm97_vm0, %v1172_v9  ;;  %2565 = vmatpush3.msra.mxu0 %v3264_v13 }
 0x3dc   :  { %2560 = vmatpush3.msra.mxu1 %v3266_v39  ;;  %v736_v11 = vpop.permute.xlu0 %735  ;;  %2561 = vmatprep.mubr.msk.f32.mxu1 %vm3089_vm6, %v3088_v57 }
 0x3dd   :  { %v740_v12 = vmul.f32 %v736_v11, %v3285_v50  ;;  %2566 = vmatprep.mubr.msk.f32.mxu0 %vm3089_vm6, %v3088_v57  ;;  %v3419_v11 = vld [vmem:[#allocation6] sm:$0xff] }
 0x3de   :  { %v734_v14 = vpop.permute.xlu1 %733 }
 0x3df   :  { %v739_v15 = vmul.f32 %v734_v14, %v3279_v46  ;;  %745 = vrot.lane.b32.xlu0 %v740_v12, %s3090_s1  ;;  %v3423_v12 = vld [vmem:[#allocation6 + $0x8] sm:$0xff] }
 0x3e0   :  { %v942_v16 = vpop.permute.xlu0 %941 }
 0x3e1   :  { %v946_v6 = vmul.f32 %v942_v16, %v3285_v50  ;;  %743 = vrot.lane.b32.xlu1 %v739_v15, %s3090_s1  ;;  %s3101_s1 = smov [#allocation12]  }
 0x3e2   :  { %v940_v13 = vpop.permute.xlu1 %939 }
 0x3e3   :  { %v945_v39 = vmul.f32 %v940_v13, %v3279_v46  ;;  %951 = vrot.lane.b32.xlu0 %v946_v6, %s3091_s15 }
 0x3e4   :  { %v1148_v17 = vpop.permute.xlu0 %1147 }
 0x3e5   :  { %v1152_v18 = vmul.f32 %v1148_v17, %v3285_v50  ;;  %949 = vrot.lane.b32.xlu1 %v945_v39, %s3091_s15  ;;  %s2315_s15 = sshll.u32 %s3101_s1, 4  ;;  %s2316_s15 = int_to_ptr.vmem [resolvable:$true] %s2315_s15 }
 0x3e6   :  { %v1146_v19 = vpop.permute.xlu1 %1145  ;;  %p3050_p10 = scmp.lt.s32.totalorder %s2316_s15, %s2316_s15 }
 0x3e7   :  { %v1151_v20 = vmul.f32 %v1146_v19, %v3279_v46  ;;  %1157 = vrot.lane.b32.xlu0 %v1152_v18, %s3092_s16  ;;  %v3391_v46 = vstv %s2332_s0 }
 0x3e9   :  { %1155 = vrot.lane.b32.xlu1 %v1151_v20, %s3092_s16  ;;  %s3045_s16 = scalar_lea.vmem %s2316_s15, 256 }
 0x3ea   :  { %p3046_p9 = scmp.ne.s32.totalorder %s2316_s15, %s3045_s16  ;;  %p3051_p11 = scmp.lt.s32.totalorder %s3045_s16, %s3045_s16 }
 0x3ec   :  { %p3052_p12 = por %p3051_p11, %p3050_p10 }
 0x3ee   :  { %p3053_p13 = pnand %p3052_p12, %p3046_p9 }
 0x406   :  { %542 = vadd.xlane.f32.xlu0 %v541_v23 }
 0x40d   :  { %539 = vadd.xlane.f32.xlu1 %v538_v24 }
 0x428   :  { %v641_v26 = vpop.f32.mrb[6].mxu0 }
 0x429   :  { %v2523_v28 = vpop.f32.mrb[7].mxu0 }
 0x42c   :  { %v729_v29 = vpop.f32.mrb[8].mxu0 }
 0x42d   :  { %v2528_v30 = vpop.f32.mrb[9].mxu0 }
 0x451   :  { %v746_v33 = vpop.permute.xlu0 %745 }
 0x452   :  { %v752_v40 = vsel %vm97_vm0, %v746_v33, 0.0 }
 0x453   :  { %v744_v34 = vpop.permute.xlu1 %743 }
 0x454   :  { %v749_v35 = vsel %vm97_vm0, %v744_v34, 0.0 }
 0x455   :  { %750 = vadd.xlane.f32.xlu0 %v749_v35  ;;  %v952_v36 = vpop.permute.xlu0 %951 }
 0x456   :  { %v958_v43 = vsel %vm97_vm0, %v952_v36, 0.0 }
 0x457   :  { %v950_v37 = vpop.permute.xlu1 %949 }
 0x458   :  { %v955_v38 = vsel %vm97_vm0, %v950_v37, 0.0 }
 0x459   :  { %956 = vadd.xlane.f32.xlu1 %v955_v38  ;;  %753 = vadd.xlane.f32.xlu0 %v752_v40  ;;  %v1158_v44 = vpop.permute.xlu0 %1157 }
 0x45a   :  { %v1164_v45 = vsel %vm97_vm0, %v1158_v44, 0.0 }
 0x45b   :  { %v1156_v41 = vpop.permute.xlu1 %1155 }
 0x45c   :  { %v1161_v42 = vsel %vm97_vm0, %v1156_v41, 0.0 }
 0x45d   :  { %1162 = vadd.xlane.f32.xlu1 %v1161_v42  ;;  %959 = vadd.xlane.f32.xlu0 %v958_v43 }
 0x461   :  { %1165 = vadd.xlane.f32.xlu0 %v1164_v45 }
 0x493   :  { %v543_v47 = vpop.xlane.xlu0 %542 }
 0x494   :  { %v546_v48 = vadd.f32 %v3391_v46, %v543_v47 }
 0x496   :  { %2897 = vtanh.f32 %v546_v48 }
 0x49a   :  { %v540_v49 = vpop.xlane.xlu1 %539 }
 0x49b   :  { %v545_v50 = vadd.f32 %v3391_v46, %v540_v49 }
 0x49d   :  { %2899 = vtanh.f32 %v545_v50  ;;  %v845_v54 = vpop.f32.mrb[10].mxu0 }
 0x49e   :  { %v2533_v55 = vpop.f32.mrb[11].mxu0 }
 0x4a0   :  { %v2898_v58 = vpop.eup %2897 }
 0x4a1   :  { %v649_v60 = vrot.slane %v2898_v58, %v3403_v56 }
 0x4a3   :  { %v730_v27 = vadd.f32 %v729_v29, %v649_v60 }
 0x4a5   :  { %v935_v61 = vpop.f32.mrb[12].mxu0  ;;  %v1370_v14 = vsel %vm3415_vm11, -1e+09, %v730_v27 }
 0x4a6   :  { %v2538_v63 = vpop.f32.mrb[13].mxu0  ;;  %v1051_v0 = vpop.f32.mrb[2].mxu1  ;;  %v3433_v18 = vadd.f32 %v1370_v14, %v3423_v12 }
 0x4a7   :  { %v2900_v1 = vpop.eup %2899  ;;  %v2543_v2 = vpop.f32.mrb[3].mxu1 }
 0x4a8   :  { %v555_v3 = vrot.slane %v2900_v1, %v3403_v56  ;;  %v1389_v19 = vsel %vm1385_vm12, %v3433_v18, -inf }
 0x4a9   :  { %v1141_v4 = vpop.f32.mrb[14].mxu0 }
 0x4aa   :  { %v2548_v8 = vpop.f32.mrb[15].mxu0  ;;  %v642_v9 = vadd.f32 %v641_v26, %v555_v3 }
 0x4ac   :  { %v1369_v31 = vsel %vm3411_vm10, -1e+09, %v642_v9 }
 0x4ad   :  { %v1347_v15 = vpop.f32.mrb[16].mxu0  ;;  %v3428_v16 = vadd.f32 %v1369_v31, %v3419_v11 }
 0x4ae   :  { %v1257_v6 = vpop.f32.mrb[4].mxu1  ;;  %v2558_v13 = vpop.f32.mrb[17].mxu0 }
 0x4af   :  { %v2553_v39 = vpop.f32.mrb[5].mxu1  ;;  %v1386_v17 = vsel %vm1385_vm12, %v3428_v16, -inf }
 0x4b0   :  { %1387 = vmax.xlane.f32.xlu1 %v1386_v17 }
 0x4b4   :  { %1390 = vmax.xlane.f32.xlu1 %v1389_v19 }
 0x4e2   :  { %v751_v20 = vpop.xlane.xlu0 %750 }
 0x4e3   :  { %v755_v21 = vadd.f32 %v751_v20, %v3391_v46 }
 0x4e5   :  { %2901 = vtanh.f32 %v755_v21 }
 0x4e6   :  { %v957_v23 = vpop.xlane.xlu1 %956  ;;  %v754_v10 = vpop.xlane.xlu0 %753 }
 0x4e7   :  { %v961_v24 = vadd.f32 %v957_v23, %v3391_v46  ;;  %v756_v26 = vadd.f32 %v754_v10, %v3391_v46 }
 0x4e9   :  { %2903 = vtanh.f32 %v961_v24 }
 0x4ea   :  { %2905 = vtanh.f32 %v756_v26  ;;  %v1163_v28 = vpop.xlane.xlu1 %1162  ;;  %v960_v29 = vpop.xlane.xlu0 %959 }
 0x4eb   :  { %v1167_v30 = vadd.f32 %v1163_v28, %v3391_v46  ;;  %v962_v33 = vadd.f32 %v960_v29, %v3391_v46 }
 0x4ed   :  { %2907 = vtanh.f32 %v1167_v30 }
 0x4ee   :  { %2909 = vtanh.f32 %v962_v33  ;;  %v1166_v34 = vpop.xlane.xlu0 %1165 }
 0x4ef   :  { %v2902_v35 = vpop.eup %2901  ;;  %v1168_v36 = vadd.f32 %v1166_v34, %v3391_v46 }
 0x4f0   :  { %v767_v37 = vrot.slane %v2902_v35, %v3403_v56 }
 0x4f1   :  { %2911 = vtanh.f32 %v1168_v36 }
 0x4f2   :  { %v846_v38 = vadd.f32 %v845_v54, %v767_v37 }
 0x4f3   :  { %v2904_v40 = vpop.eup %2903 }
 0x4f4   :  { %v2906_v41 = vpop.eup %2905  ;;  %v1371_v42 = vsel %vm3411_vm10, -1e+09, %v846_v38  ;;  %v973_v43 = vrot.slane %v2904_v40, %v3403_v56 }
 0x4f5   :  { %v1379_v44 = vadd.f32 %v1371_v42, %v3419_v11  ;;  %v857_v45 = vrot.slane %v2906_v41, %v3403_v56 }
 0x4f6   :  { %v1052_v47 = vadd.f32 %v1051_v0, %v973_v43 }
 0x4f7   :  { %v2908_v48 = vpop.eup %2907  ;;  %v1392_v49 = vsel %vm1385_vm12, %v1379_v44, -inf  ;;  %v936_v46 = vadd.f32 %v935_v61, %v857_v45 }
 0x4f8   :  { %v2910_v50 = vpop.eup %2909  ;;  %1393 = vmax.xlane.f32.xlu0 %v1392_v49  ;;  %v1373_v51 = vsel %vm3411_vm10, -1e+09, %v1052_v47  ;;  %v1179_v52 = vrot.slane %v2908_v48, %v3403_v56 }
 0x4f9   :  { %v1381_v53 = vadd.f32 %v1373_v51, %v3419_v11  ;;  %v1372_v54 = vsel %vm3415_vm11, -1e+09, %v936_v46  ;;  %v1063_v55 = vrot.slane %v2910_v50, %v3403_v56 }
 0x4fa   :  { %v1380_v58 = vadd.f32 %v1372_v54, %v3423_v12  ;;  %v1258_v59 = vadd.f32 %v1257_v6, %v1179_v52  ;;  %v1474_v52 = vld [vmem:[#allocation9 + $0x18] sm:$0xff] }
 0x4fb   :  { %v2912_v22 = vpop.eup %2911  ;;  %v1398_v60 = vsel %vm1385_vm12, %v1381_v53, -inf  ;;  %v1142_v61 = vadd.f32 %v1141_v4, %v1063_v55 }
 0x4fc   :  { %1399 = vmax.xlane.f32.xlu1 %v1398_v60  ;;  %v1395_v32 = vsel %vm1385_vm12, %v1380_v58, -inf  ;;  %v1375_v62 = vsel %vm3411_vm10, -1e+09, %v1258_v59  ;;  %v1269_v63 = vrot.slane %v2912_v22, %v3403_v56 }
 0x4fd   :  { %1396 = vmax.xlane.f32.xlu0 %v1395_v32  ;;  %v1383_v0 = vadd.f32 %v1375_v62, %v3419_v11  ;;  %v1374_v1 = vsel %vm3415_vm11, -1e+09, %v1142_v61  ;;  %v1881_v61 = vstv %s3510_s2 }
 0x4fe   :  { %v1382_v2 = vadd.f32 %v1374_v1, %v3423_v12  ;;  %v1348_v3 = vadd.f32 %v1347_v15, %v1269_v63  ;;  %v1947_v63 = vstv %s3512_s20  ;;  %v2013_v1 = vstv %s3516_s22 }
 0x4ff   :  { %v1404_v27 = vsel %vm1385_vm12, %v1383_v0, -inf }
 0x500   :  { %1405 = vmax.xlane.f32.xlu1 %v1404_v27  ;;  %v1401_v4 = vsel %vm1385_vm12, %v1382_v2, -inf  ;;  %v1376_v5 = vsel %vm3415_vm11, -1e+09, %v1348_v3  ;;  %v1884_v3 = vstv %s3518_s23  ;;  %v1950_v27 = vstv %s3520_s24 }
 0x501   :  { %1402 = vmax.xlane.f32.xlu0 %v1401_v4  ;;  %v1384_v8 = vadd.f32 %v1376_v5, %v3423_v12  ;;  %v1816_v4 = vstv %s3522_s3 }
 0x503   :  { %v1407_v9 = vsel %vm1385_vm12, %v1384_v8, -inf }
 0x505   :  { %1408 = vmax.xlane.f32.xlu0 %v1407_v9  ;;  %v2016_v9 = vstv %s3524_s4 }
 0x53d   :  { %v1388_v11 = vpop.xlane.xlu1 %1387 }
 0x53e   :  { %v1410_v31 = vsub.f32 %v3428_v16, %v1388_v11  ;;  %v1894_v11 = vstv %s3534_s8 }
 0x540   :  { %v1418_v14 = vmul.f32 1.442695, %v1410_v31  ;;  %v1954_v31 = vstv %s3528_s26 }
 0x541   :  { %v1391_v6 = vpop.xlane.xlu1 %1390 }
 0x542   :  { %2913 = vpow2.f32 %v1418_v14  ;;  %v1411_v15 = vsub.f32 %v3433_v18, %v1391_v6  ;;  %v1820_v14 = vstv %s3530_s28  ;;  %v2020_v6 = vstv %s3532_s29 }
 0x544   :  { %v1420_v13 = vmul.f32 1.442695, %v1411_v15 }
 0x546   :  { %2915 = vpow2.f32 %v1420_v13  ;;  %v1476_v13 = vld [vmem:[#allocation9 + $0x68] sm:$0xff] }
 0x54c   :  { %v3475_v39 = vpop.eup %2913 }
 0x54d   :  { %v1434_v7 = vsel %vm1385_vm12, %v3475_v39, 0.0 }
 0x54e   :  { %1435 = vadd.xlane.f32.xlu1 %v1434_v7  ;;  %v1826_v7 = vstv %s3538_s10 }
 0x550   :  { %v3479_v12 = vpop.eup %2915 }
 0x551   :  { %v1437_v17 = vsel %vm1385_vm12, %v3479_v12, 0.0 }
 0x552   :  { %1438 = vadd.xlane.f32.xlu1 %v1437_v17 }
 0x585   :  { %v1394_v16 = vpop.xlane.xlu0 %1393 }
 0x586   :  { %v1412_v19 = vsub.f32 %v1379_v44, %v1394_v16  ;;  %v2026_v16 = vstv %s3540_s11 }
 0x588   :  { %v1422_v20 = vmul.f32 1.442695, %v1412_v19  ;;  %v1477_v19 = vld [vmem:[#allocation9 + $0x90] sm:$0xff] }
 0x589   :  { %v1400_v21 = vpop.xlane.xlu1 %1399 }
 0x58a   :  { %2917 = vpow2.f32 %v1422_v20  ;;  %v1414_v18 = vsub.f32 %v1381_v53, %v1400_v21  ;;  %v1397_v23 = vpop.xlane.xlu0 %1396  ;;  %v1475_v53 = vld [vmem:[#allocation9 + $0x40] sm:$0xff]  ;;  %v1478_v20 = vld [vmem:[#allocation9 + $0xb8] sm:$0xff] }
 0x58b   :  { %v1413_v10 = vsub.f32 %v1380_v58, %v1397_v23  ;;  %v3507_v54 = vpack.c.bf16 %v1475_v53, %v1474_v52  ;;  %v1479_v21 = vld [vmem:[#allocation9 + $0xe0] sm:$0xff] }
 0x58c   :  { %v1426_v24 = vmul.f32 1.442695, %v1414_v18 }
 0x58d   :  { %v1424_v26 = vmul.f32 1.442695, %v1413_v10  ;;  %v1406_v28 = vpop.xlane.xlu1 %1405  ;;  %2749 = vmatprep.subr.bf16.mxu1 %v3507_v54 }
 0x58e   :  { %2919 = vpow2.f32 %v1426_v24  ;;  %v1416_v29 = vsub.f32 %v1383_v0, %v1406_v28  ;;  %v1403_v30 = vpop.xlane.xlu0 %1402  ;;  %v1813_v0 = vstv %s3514_s21  ;;  %v1966_v28 = vstv %s3544_s6 }
 0x58f   :  { %2921 = vpow2.f32 %v1424_v26  ;;  %v1415_v33 = vsub.f32 %v1382_v2, %v1403_v30  ;;  %v1900_v26 = vstv %s3542_s5 }
 0x590   :  { %v1430_v34 = vmul.f32 1.442695, %v1416_v29 }
 0x591   :  { %v1428_v35 = vmul.f32 1.442695, %v1415_v33 }
 0x592   :  { %2923 = vpow2.f32 %v1430_v34  ;;  %v1409_v36 = vpop.xlane.xlu0 %1408  ;;  %v1832_v34 = vstv %s3547_s30 }
 0x593   :  { %2925 = vpow2.f32 %v1428_v35  ;;  %v1417_v37 = vsub.f32 %v1384_v8, %v1409_v36  ;;  %v1888_v8 = vstv %s3526_s25  ;;  %v2032_v35 = vstv %s3549_s12 }
 0x594   :  { %v3483_v38 = vpop.eup %2917 }
 0x595   :  { %v1432_v40 = vmul.f32 1.442695, %v1417_v37  ;;  %v1440_v41 = vsel %vm1385_vm12, %v3483_v38, 0.0  ;;  %v3578_v37 = vpack.c.bf16 %v1477_v19, %v1476_v13 }
 0x596   :  { %1441 = vadd.xlane.f32.xlu0 %v1440_v41 }
 0x597   :  { %2927 = vpow2.f32 %v1432_v40  ;;  %v3580_v40 = vpack.c.bf16 %v1479_v21, %v1478_v20 }
 0x598   :  { %v3487_v42 = vpop.eup %2919 }
 0x599   :  { %v3489_v43 = vpop.eup %2921  ;;  %v1446_v44 = vsel %vm1385_vm12, %v3487_v42, 0.0 }
 0x59a   :  { %1447 = vadd.xlane.f32.xlu1 %v1446_v44  ;;  %v1443_v45 = vsel %vm1385_vm12, %v3489_v43, 0.0 }
 0x59b   :  { %1444 = vadd.xlane.f32.xlu0 %v1443_v45 }
 0x59c   :  { %v3495_v47 = vpop.eup %2923 }
 0x59d   :  { %v3497_v48 = vpop.eup %2925  ;;  %v1452_v49 = vsel %vm1385_vm12, %v3495_v47, 0.0 }
 0x59e   :  { %1453 = vadd.xlane.f32.xlu1 %v1452_v49  ;;  %v1449_v46 = vsel %vm1385_vm12, %v3497_v48, 0.0 }
 0x59f   :  { %1450 = vadd.xlane.f32.xlu0 %v1449_v46 }
 0x5a1   :  { %v3503_v50 = vpop.eup %2927 }
 0x5a2   :  { %v1455_v51 = vsel %vm1385_vm12, %v3503_v50, 0.0 }
 0x5a3   :  { %1456 = vadd.xlane.f32.xlu0 %v1455_v51 }
 0x5db   :  { %v1436_v55 = vpop.xlane.xlu1 %1435 }
 0x5dc   :  { %2929 = vrcp.f32 %v1436_v55 }
 0x5df   :  { %v1439_v58 = vpop.xlane.xlu1 %1438 }
 0x5e0   :  { %2931 = vrcp.f32 %v1439_v58 }
 0x5e6   :  { %v2930_v22 = vpop.eup %2929 }
 0x5e7   :  { %v1466_v32 = vmul.f32 %v2930_v22, %v3475_v39  ;;  %v1960_v39 = vstv %s3536_s9 }
 0x5e9   :  { %v1814_v17 = vmul.f32 %v1813_v0, %v1466_v32  ;;  %v1882_v18 = vmul.f32 %v1881_v61, %v1466_v32  ;;  %v1948_v23 = vmul.f32 %v1947_v63, %v1466_v32  ;;  %v2014_v10 = vmul.f32 %v2013_v1, %v1466_v32 }
 0x5ea   :  { %v2932_v60 = vpop.eup %2931 }
 0x5eb   :  { %v3559_v5 = vmul.f32 %v2932_v60, %v3479_v12  ;;  %v1817_v45 = vadd.f32 %v1816_v4, %v1814_v17  ;;  %v1885_v49 = vadd.f32 %v1884_v3, %v1882_v18  ;;  %v1951_v46 = vadd.f32 %v1950_v27, %v1948_v23 }
 0x5ec   :  { %v2017_v51 = vadd.f32 %v2016_v9, %v2014_v10 }
 0x5ed   :  { %v1883_v24 = vmul.f32 %v1881_v61, %v3559_v5  ;;  %v1949_v30 = vmul.f32 %v1947_v63, %v3559_v5  ;;  %v1815_v33 = vmul.f32 %v1813_v0, %v3559_v5  ;;  %v2015_v41 = vmul.f32 %v2013_v1, %v3559_v5 }
 0x5ef   :  { %v1886_v52 = vadd.f32 %v1884_v3, %v1883_v24  ;;  %v2018_v1 = vadd.f32 %v2016_v9, %v2015_v41 }
 0x623   :  { %v1442_v59 = vpop.xlane.xlu0 %1441 }
 0x624   :  { %2933 = vrcp.f32 %v1442_v59  ;;  %v1818_v59 = vadd.f32 %v1816_v4, %v1815_v33 }
 0x627   :  { %v1448_v62 = vpop.xlane.xlu1 %1447 }
 0x628   :  { %2935 = vrcp.f32 %v1448_v62  ;;  %v1445_v2 = vpop.xlane.xlu0 %1444 }
 0x629   :  { %2937 = vrcp.f32 %v1445_v2 }
 0x62b   :  { %v1454_v15 = vpop.xlane.xlu1 %1453 }
 0x62c   :  { %2939 = vrcp.f32 %v1454_v15  ;;  %v1451_v12 = vpop.xlane.xlu0 %1450 }
 0x62d   :  { %2941 = vrcp.f32 %v1451_v12 }
 0x62e   :  { %v2934_v29 = vpop.eup %2933 }
 0x62f   :  { %v1468_v36 = vmul.f32 %v2934_v29, %v3483_v38  ;;  %v1952_v38 = vadd.f32 %v1950_v27, %v1949_v30 }
 0x630   :  { %v1457_v44 = vpop.xlane.xlu0 %1456 }
 0x631   :  { %2943 = vrcp.f32 %v1457_v44  ;;  %v1821_v53 = vmul.f32 %v1820_v14, %v1468_v36  ;;  %v1889_v55 = vmul.f32 %v1888_v8, %v1468_v36  ;;  %v1955_v22 = vmul.f32 %v1954_v31, %v1468_v36 }
 0x632   :  { %v2936_v58 = vpop.eup %2935  ;;  %v2021_v60 = vmul.f32 %v2020_v6, %v1468_v36  ;;  %v1507_v63 = vadd.f32 %v1468_v36, %v1466_v32 }
 0x633   :  { %v2938_v61 = vpop.eup %2937  ;;  %v1470_v62 = vmul.f32 %v2936_v58, %v3487_v42  ;;  %v1823_v0 = vadd.f32 %v1821_v53, %v1817_v45  ;;  %v1891_v3 = vadd.f32 %v1889_v55, %v1885_v49  ;;  %v1957_v15 = vadd.f32 %v1955_v22, %v1951_v46  ;;  %v1480_v22 = vld [vmem:[#allocation9 + $0x108] sm:$0xff] }
 0x634   :  { %v1469_v2 = vmul.f32 %v2938_v61, %v3489_v43  ;;  %v2023_v13 = vadd.f32 %v2021_v60, %v2017_v51  ;;  %v1481_v60 = vld [vmem:[#allocation9 + $0x130] sm:$0xff] }
 0x635   :  { %v1509_v17 = vadd.f32 %v1507_v63, %v1470_v62  ;;  %v1827_v12 = vmul.f32 %v1826_v7, %v1470_v62  ;;  %v1895_v27 = vmul.f32 %v1894_v11, %v1470_v62  ;;  %v1961_v4 = vmul.f32 %v1960_v39, %v1470_v62 }
 0x636   :  { %v2940_v19 = vpop.eup %2939  ;;  %v1508_v42 = vadd.f32 %v1469_v2, %v3559_v5  ;;  %v1890_v32 = vmul.f32 %v1888_v8, %v1469_v2  ;;  %v1956_v9 = vmul.f32 %v1954_v31, %v1469_v2  ;;  %v1822_v43 = vmul.f32 %v1820_v14, %v1469_v2 }
 0x637   :  { %v2942_v20 = vpop.eup %2941  ;;  %v1472_v21 = vmul.f32 %v2940_v19, %v3495_v47  ;;  %v1829_v18 = vadd.f32 %v1827_v12, %v1823_v0  ;;  %v1897_v23 = vadd.f32 %v1895_v27, %v1891_v3  ;;  %v1963_v10 = vadd.f32 %v1961_v4, %v1957_v15  ;;  %v1483_v15 = vld [vmem:[#allocation9 + $0x180] sm:$0xff]  ;;  %v1486_v27 = vld [vmem:[#allocation9 + $0x1f8] sm:$0xff] }
 0x638   :  { %v1471_v24 = vmul.f32 %v2942_v20, %v3497_v48  ;;  %v1892_v29 = vadd.f32 %v1890_v32, %v1886_v52  ;;  %v1958_v30 = vadd.f32 %v1956_v9, %v1952_v38  ;;  %v1824_v33 = vadd.f32 %v1822_v43, %v1818_v59  ;;  %v1487_v4 = vld [vmem:[#allocation9 + $0x220] sm:$0xff]  ;;  %v1489_v32 = vld [vmem:[#allocation9 + $0x270] sm:$0xff]  ;;  %v1492_v20 = vld [vmem:[#allocation9 + $0x48] sm:$0xff] }
 0x639   :  { %v1511_v5 = vadd.f32 %v1509_v17, %v1472_v21  ;;  %v1833_v8 = vmul.f32 %v1832_v34, %v1472_v21  ;;  %v1901_v31 = vmul.f32 %v1900_v26, %v1472_v21  ;;  %v1967_v14 = vmul.f32 %v1966_v28, %v1472_v21  ;;  %v1485_v17 = vld [vmem:[#allocation9 + $0x1d0] sm:$0xff]  ;;  %v1491_v43 = vld [vmem:[#allocation9 + $0x20] sm:$0xff] }
 0x63a   :  { %v1510_v36 = vadd.f32 %v1508_v42, %v1471_v24  ;;  %v1896_v41 = vmul.f32 %v1894_v11, %v1471_v24  ;;  %v1962_v47 = vmul.f32 %v1960_v39, %v1471_v24  ;;  %v1828_v48 = vmul.f32 %v1826_v7, %v1471_v24  ;;  %v1488_v42 = vld [vmem:[#allocation9 + $0x248] sm:$0xff] }
 0x63b   :  { %v2944_v44 = vpop.eup %2943  ;;  %2562 = vmatmul.mubr.msk.f32.vlgmr.msra.gmra.mrb[6].mxu1 %vm1385_vm12, %v1511_v5  ;;  %v3609_v45 = vadd.f32 %v1833_v8, %v1829_v18  ;;  %v3611_v49 = vadd.f32 %v1901_v31, %v1897_v23  ;;  %v3613_v46 = vadd.f32 %v1967_v14, %v1963_v10  ;;  %v2027_v11 = vmul.f32 %v2026_v16, %v1470_v62  ;;  %v1494_v23 = vld [vmem:[#allocation9 + $0x98] sm:$0xff]  ;;  %v1499_v31 = vld [vmem:[#allocation9 + $0x160] sm:$0xff]  ;;  %v1500_v14 = vld [vmem:[#allocation9 + $0x188] sm:$0xff] }
 0x63c   :  { %v1473_v39 = vmul.f32 %v2944_v44, %v3503_v50  ;;  %2751 = vmatpush3.bf16.msra.mxu1 %v3507_v54  ;;  %v1898_v7 = vadd.f32 %v1896_v41, %v1892_v29  ;;  %v1964_v51 = vadd.f32 %v1962_v47, %v1958_v30  ;;  %v1830_v52 = vadd.f32 %v1828_v48, %v1824_v33  ;;  %v1496_v29 = vld [vmem:[#allocation9 + $0xe8] sm:$0xff]  ;;  %v1497_v33 = vld [vmem:[#allocation9 + $0x110] sm:$0xff]  ;;  %v1498_v5 = vld [vmem:[#allocation9 + $0x138] sm:$0xff] }
 0x63d   :  { %2753 = vmatprep.subr.bf16.mxu1 %v3578_v37  ;;  %v2029_v53 = vadd.f32 %v2027_v11, %v2023_v13  ;;  %v2033_v55 = vmul.f32 %v2032_v35, %v1472_v21  ;;  %v2022_v58 = vmul.f32 %v2020_v6, %v1469_v2  ;;  %v2028_v38 = vmul.f32 %v2026_v16, %v1471_v24  ;;  %v1484_v13 = vld [vmem:[#allocation9 + $0x1a8] sm:$0xff]  ;;  %v1493_v21 = vld [vmem:[#allocation9 + $0x70] sm:$0xff]  ;;  %v1495_v24 = vld [vmem:[#allocation9 + $0xc0] sm:$0xff] }
 0x63e   :  { %v1512_v59 = vadd.f32 %v1510_v36, %v1473_v39  ;;  %v1902_v50 = vmul.f32 %v1900_v26, %v1473_v39  ;;  %v1968_v61 = vmul.f32 %v1966_v28, %v1473_v39  ;;  %v1834_v62 = vmul.f32 %v1832_v34, %v1473_v39  ;;  %v1482_v34 = vld [vmem:[#allocation9 + $0x158] sm:$0xff]  ;;  %v1501_v41 = vld [vmem:[#allocation9 + $0x1b0] sm:$0xff]  ;;  %v1503_v44 = vld [vmem:[#allocation9 + $0x200] sm:$0xff] }
 0x63f   :  { %v3632_v63 = vadd.f32 %v2033_v55, %v2029_v53  ;;  %v2024_v0 = vadd.f32 %v2022_v58, %v2018_v1  ;;  %v2034_v3 = vmul.f32 %v2032_v35, %v1473_v39  ;;  %v3645_v26 = vpack.c.bf16 %v1481_v60, %v1480_v22  ;;  %v1502_v47 = vld [vmem:[#allocation9 + $0x1d8] sm:$0xff]  ;;  %v1504_v11 = vld [vmem:[#allocation9 + $0x228] sm:$0xff]  ;;  %v1505_v55 = vld [vmem:[#allocation9 + $0x250] sm:$0xff] }
 0x640   :  { %2567 = vmatmul.mubr.msk.f32.vlgmr.msra.gmra.mrb[18].mxu0 %vm1385_vm12, %v1512_v59  ;;  %2755 = vmatpush3.bf16.msra.mxu1 %v3578_v37  ;;  %v3638_v6 = vadd.f32 %v1902_v50, %v1898_v7  ;;  %v3640_v16 = vadd.f32 %v1968_v61, %v1964_v51  ;;  %v3642_v2 = vadd.f32 %v1834_v62, %v1830_v52  ;;  %v1506_v58 = vld [vmem:[#allocation9 + $0x278] sm:$0xff]  ;;  %v3094_v59 = vmov 5  }
 0x641   :  { %2757 = vmatprep.subr.bf16.mxu1 %v3580_v40  ;;  %v2030_v28 = vadd.f32 %v2028_v38, %v2024_v0  ;;  %v3651_v35 = vpack.c.bf16 %v1483_v15, %v1482_v34  ;;  %v3655_v12 = vpack.c.bf16 %v1485_v17, %v1484_v13  ;;  %v3659_v19 = vpack.c.bf16 %v1487_v4, %v1486_v27  ;;  %v3672_v22 = vld [vmem:[#allocation9 + $0x298] ss:$0 sm:$0xff] }
 0x642   :  { %v3664_v9 = vpack.c.bf16 %v1489_v32, %v1488_v42  ;;  %v2780_v18 = vpack.c.bf16 %v1492_v20, %v1491_v43  ;;  %v2784_v10 = vpack.c.bf16 %v1494_v23, %v1493_v21  ;;  %v2788_v30 = vpack.c.bf16 %v1496_v29, %v1495_v24  ;;  %2873 = vset.pattern.permute.xlu0 %v3094_v59 }
 0x643   :  { %v3647_v1 = vadd.f32 %v2034_v3, %v2030_v28  ;;  %v2792_v8 = vpack.c.bf16 %v1498_v5, %v1497_v33  ;;  %v2796_v36 = vpack.c.bf16 %v1500_v14, %v1499_v31  ;;  %v2800_v48 = vpack.c.bf16 %v1502_v47, %v1501_v41 }
 0x644   :  { %2759 = vmatpush3.bf16.msra.mxu1 %v3580_v40  ;;  %2781 = vmatprep.subr.bf16.mxu0 %v2780_v18  ;;  %v2804_v39 = vpack.c.bf16 %v1504_v11, %v1503_v44  ;;  %v2808_v38 = vpack.c.bf16 %v1506_v58, %v1505_v55  ;;  %v3095_v15 = vmov 1   ;;  %v3096_v13 = vmov 2  }
 0x645   :  { %2761 = vmatprep.subr.bf16.mxu1 %v3645_v26  ;;  %2783 = vmatpush3.bf16.msra.mxu0 %v2780_v18  ;;  %v3097_v17 = vmov 6   ;;  %v3098_v27 = vmov 4   ;;  %v3099_v4 = vmov 7  }
 0x646   :  { %2785 = vmatprep.subr.bf16.mxu0 %v2784_v10 }
 0x648   :  { %2763 = vmatpush3.bf16.msra.mxu1 %v3645_v26 }
 0x649   :  { %2765 = vmatprep.subr.bf16.mxu1 %v3651_v35  ;;  %2787 = vmatpush3.bf16.msra.mxu0 %v2784_v10 }
 0x64a   :  { %2789 = vmatprep.subr.bf16.mxu0 %v2788_v30 }
 0x64c   :  { %2767 = vmatpush3.bf16.msra.mxu1 %v3651_v35 }
 0x64d   :  { %2769 = vmatprep.subr.bf16.mxu1 %v3655_v12  ;;  %2791 = vmatpush3.bf16.msra.mxu0 %v2788_v30 }
 0x64e   :  { %2793 = vmatprep.subr.bf16.mxu0 %v2792_v8 }
 0x650   :  { %2771 = vmatpush3.bf16.msra.mxu1 %v3655_v12 }
 0x651   :  { %2773 = vmatprep.subr.bf16.mxu1 %v3659_v19  ;;  %2795 = vmatpush3.bf16.msra.mxu0 %v2792_v8 }
 0x652   :  { %2797 = vmatprep.subr.bf16.mxu0 %v2796_v36 }
 0x654   :  { %2775 = vmatpush3.bf16.msra.mxu1 %v3659_v19 }
 0x655   :  { %2777 = vmatprep.subr.bf16.mxu1 %v3664_v9  ;;  %2799 = vmatpush3.bf16.msra.mxu0 %v2796_v36 }
 0x656   :  { %2801 = vmatprep.subr.bf16.mxu0 %v2800_v48 }
 0x658   :  { %2779 = vmatpush3.bf16.msra.mxu1 %v3664_v9 }
 0x659   :  { %2639 = vmatprep.subr.mxu1 %v3088_v57  ;;  %2803 = vmatpush3.bf16.msra.mxu0 %v2800_v48 }
 0x65a   :  { %2805 = vmatprep.subr.bf16.mxu0 %v2804_v39 }
 0x65d   :  { %2807 = vmatpush3.bf16.msra.mxu0 %v2804_v39 }
 0x65e   :  { %2809 = vmatprep.subr.bf16.mxu0 %v2808_v38 }
 0x661   :  { %2811 = vmatpush3.bf16.msra.mxu0 %v2808_v38 }
 0x662   :  { %2644 = vmatprep.subr.mxu0 %v3088_v57 }
 0x70e   :  { %v1582_v7 = vpop.f32.mrb[6].mxu1 }
 0x70f   :  { %v2563_v51 = vpop.f32.mrb[7].mxu1  ;;  %2601 = vmatprep.mubr.f32.mxu1 %v1582_v7 }
 0x713   :  { %v1655_v52 = vpop.f32.mrb[18].mxu0 }
 0x714   :  { %v2568_v53 = vpop.f32.mrb[19].mxu0  ;;  %2602 = vmatmul.mubr.f32.vlgmr.msra.gmra.mrb[8].mxu1 %v1655_v52 }
 0x715   :  { %2641 = vmatprep.mubr.msk.f32.mxu1 %vm3089_vm6, %v3088_v57 }
 0x7e7   :  { %v2603_v60 = vpop.f32.mrb[8].mxu1 }
 0x7e8   :  { %v1731_v50 = vadd.f32 %v2603_v60, %v3672_v22  ;;  %v1725_v61 = vpop.f32.mrb[9].mxu1 }
 0x7e9   :  { %v1726_v62 = vadd.f32 %v1725_v61, %v3672_v22 }
 0x7ea   :  { %v1735_v3 = vmax.f32 %v1731_v50, 0.0 }
 0x7eb   :  { %v1734_v0 = vmax.f32 %v1726_v62, 0.0 }
 0x7ed   :  { %2636 = vmatprep.mubr.f32.mxu0 %v1734_v0  ;;  %2640 = vmatpush3.msra.mxu1 %v1734_v0 }
 0x7ee   :  { %2637 = vmatmul.mubr.f32.vlgmr.msra.gmra.mrb[20].mxu0 %v1735_v3  ;;  %2813 = vmatprep.subr.bf16.mxu1 %v3507_v54 }
 0x7ef   :  { %2645 = vmatpush3.msra.mxu0 %v1735_v3  ;;  %2646 = vmatprep.mubr.msk.f32.mxu0 %vm3089_vm6, %v3088_v57  ;;  %v3100_v57 = vmov 3  }
 0x8c1   :  { %v2638_v28 = vpop.f32.mrb[20].mxu0 }
 0x8c2   :  { %1940 = vperm.xlu0 %2873, %v2638_v28   ;;  %1843 = vperm.xlu1 %2869, %v2638_v28   ;;  %v1802_v34 = vpop.f32.mrb[21].mxu0 }
 0x8c6   :  { %2876 = vset.pattern.permute.xlu0 %v3095_v15  ;;  %2870 = vset.pattern.permute.xlu1 %v3095_v15 }
 0x8c7   :  { %1909 = vperm.xlu1 %2870, %v2638_v28   ;;  %1906 = vperm.xlu0 %2876, %v1802_v34  }
 0x8cb   :  { %2871 = vset.pattern.permute.xlu1 %v3096_v13  ;;  %2882 = vset.pattern.permute.xlu0 %v3097_v17 }
 0x8cc   :  { %1975 = vperm.xlu1 %2871, %v2638_v28   ;;  %2006 = vperm.xlu0 %2882, %v2638_v28  }
 0x8d0   :  { %2872 = vset.pattern.permute.xlu1 %v3098_v27  ;;  %2884 = vset.pattern.permute.xlu0 %v3099_v4 }
 0x8d1   :  { %1874 = vperm.xlu1 %2872, %v2638_v28  }
 0x8d5   :  { %2874 = vset.pattern.permute.xlu1 %v3100_v57 }
 0x8d6   :  { %2041 = vperm.xlu1 %2874, %v2638_v28  }
 0x8da   :  { %2875 = vset.pattern.permute.xlu1 %v3093_v25 }
 0x8db   :  { %1840 = vperm.xlu1 %2875, %v1802_v34  }
 0x8df   :  { %2877 = vset.pattern.permute.xlu1 %v3096_v13 }
 0x8e0   :  { %1972 = vperm.xlu1 %2877, %v1802_v34  }
 0x8e4   :  { %2878 = vset.pattern.permute.xlu1 %v3098_v27 }
 0x8e5   :  { %1870 = vperm.xlu1 %2878, %v1802_v34  }
 0x8e9   :  { %2879 = vset.pattern.permute.xlu1 %v3094_v59 }
 0x8ea   :  { %1936 = vperm.xlu1 %2879, %v1802_v34  }
 0x8ee   :  { %2880 = vset.pattern.permute.xlu1 %v3100_v57 }
 0x8ef   :  { %2038 = vperm.xlu1 %2880, %v1802_v34  }
 0x8f3   :  { %2881 = vset.pattern.permute.xlu1 %v3097_v17 }
 0x8f4   :  { %2002 = vperm.xlu1 %2881, %v1802_v34  }
 0x8f8   :  { %2883 = vset.pattern.permute.xlu1 %v3099_v4 }
 0x8f9   :  { %2068 = vperm.xlu1 %2883, %v1802_v34  }
 0x8fd   :  { %2072 = vperm.xlu1 %2883, %v2638_v28  }
 0x941   :  { %v1844_v42 = vpop.permute.xlu1 %1843  ;;  %v1941_v32 = vpop.permute.xlu0 %1940 }
 0x942   :  { %v1852_v25 = vrot.slane %v1844_v42, %v3403_v56 }
 0x944   :  { %v1868_v29 = vadd.f32 %v1852_v25, %v3642_v2 }
 0x946   :  { %v1910_v43 = vpop.permute.xlu1 %1909  ;;  %v1907_v18 = vpop.permute.xlu0 %1906 }
 0x947   :  { %v1918_v20 = vrot.slane %v1910_v43, %v3403_v56  ;;  %v1914_v44 = vrot.slane %v1907_v18, %v3403_v56 }
 0x949   :  { %v1934_v10 = vadd.f32 %v1918_v20, %v3638_v6 }
 0x94b   :  { %v1976_v21 = vpop.permute.xlu1 %1975  ;;  %v1944_v33 = vadd.f32 %v1941_v32, %v1934_v10  ;;  %v2007_v8 = vpop.permute.xlu0 %2006 }
 0x94c   :  { %v1984_v23 = vrot.slane %v1976_v21, %v3403_v56 }
 0x94e   :  { %v2000_v24 = vadd.f32 %v1984_v23, %v3640_v16  ;;  %v1933_v16 = vadd.f32 %v1914_v44, %v3611_v49 }
 0x950   :  { %v1875_v30 = vpop.permute.xlu1 %1874  ;;  %v2010_v31 = vadd.f32 %v2007_v8, %v2000_v24 }
 0x951   :  { %v1878_v5 = vadd.f32 %v1875_v30, %v1868_v29 }
 0x953   :  { %v2078_v14 = vadd.f32 %v1944_v33, %v1878_v5 }
 0x955   :  { %v2042_v36 = vpop.permute.xlu1 %2041  ;;  %v2080_v41 = vadd.f32 %v2078_v14, %v2010_v31 }
 0x956   :  { %v2050_v61 = vrot.slane %v2042_v36, %v3403_v56 }
 0x958   :  { %v2066_v3 = vadd.f32 %v2050_v61, %v3647_v1 }
 0x95a   :  { %v1841_v47 = vpop.permute.xlu1 %1840 }
 0x95b   :  { %v1848_v11 = vrot.slane %v1841_v47, %v3403_v56 }
 0x95d   :  { %v1867_v6 = vadd.f32 %v1848_v11, %v3609_v45 }
 0x95f   :  { %v1973_v48 = vpop.permute.xlu1 %1972 }
 0x960   :  { %v1980_v53 = vrot.slane %v1973_v48, %v3403_v56 }
 0x962   :  { %v1999_v58 = vadd.f32 %v1980_v53, %v3613_v46 }
 0x964   :  { %v1871_v39 = vpop.permute.xlu1 %1870 }
 0x965   :  { %v1877_v7 = vadd.f32 %v1871_v39, %v1867_v6 }
 0x969   :  { %v1937_v2 = vpop.permute.xlu1 %1936 }
 0x96a   :  { %v1943_v51 = vadd.f32 %v1937_v2, %v1933_v16 }
 0x96c   :  { %v2077_v52 = vadd.f32 %v1943_v51, %v1877_v7 }
 0x96e   :  { %v2039_v55 = vpop.permute.xlu1 %2038 }
 0x96f   :  { %v2046_v38 = vrot.slane %v2039_v55, %v3403_v56 }
 0x971   :  { %v2065_v45 = vadd.f32 %v2046_v38, %v3632_v63 }
 0x973   :  { %v2003_v59 = vpop.permute.xlu1 %2002 }
 0x974   :  { %v2009_v60 = vadd.f32 %v2003_v59, %v1999_v58 }
 0x976   :  { %v2079_v50 = vadd.f32 %v2077_v52, %v2009_v60 }
 0x978   :  { %v2069_v62 = vpop.permute.xlu1 %2068 }
 0x979   :  { %v2075_v49 = vadd.f32 %v2069_v62, %v2065_v45 }
 0x97b   :  { %v2081_v0 = vadd.f32 %v2079_v50, %v2075_v49 }
 0x97c   :  { %v2073_v28 = vpop.permute.xlu1 %2072 }
 0x97d   :  { %v2076_v34 = vadd.f32 %v2073_v28, %v2066_v3  ;;  %2642 = vmatmul.mubr.msk.f32.vlgmr.msra.gmra.mrb[10].mxu1 %vm1385_vm12, %v2081_v0 }
 0x97e   :  { %2815 = vmatpush3.bf16.msra.mxu1 %v3507_v54 }
 0x97f   :  { %v2082_v46 = vadd.f32 %v2080_v41, %v2076_v34  ;;  %2817 = vmatprep.subr.bf16.mxu1 %v3578_v37 }
 0x981   :  { %2647 = vmatmul.mubr.msk.f32.vlgmr.msra.gmra.mrb[22].mxu0 %vm1385_vm12, %v2082_v46 }
 0x982   :  { %2819 = vmatpush3.bf16.msra.mxu1 %v3578_v37 }
 0x983   :  { %2821 = vmatprep.subr.bf16.mxu1 %v3580_v40 }
 0x986   :  { %2823 = vmatpush3.bf16.msra.mxu1 %v3580_v40 }
 0x987   :  { %2825 = vmatprep.subr.bf16.mxu1 %v3645_v26 }
 0x98a   :  { %2827 = vmatpush3.bf16.msra.mxu1 %v3645_v26 }
 0x98b   :  { %2829 = vmatprep.subr.bf16.mxu1 %v3651_v35 }
 0x98e   :  { %2831 = vmatpush3.bf16.msra.mxu1 %v3651_v35 }
 0x98f   :  { %2833 = vmatprep.subr.bf16.mxu1 %v3655_v12 }
 0x992   :  { %2835 = vmatpush3.bf16.msra.mxu1 %v3655_v12 }
 0x993   :  { %2837 = vmatprep.subr.bf16.mxu1 %v3659_v19 }
 0x996   :  { %2839 = vmatpush3.bf16.msra.mxu1 %v3659_v19 }
 0x997   :  { %2841 = vmatprep.subr.bf16.mxu1 %v3664_v9 }
 0x99a   :  { %2843 = vmatpush3.bf16.msra.mxu1 %v3664_v9 }
 0xa50   :  { %v2152_v56 = vpop.f32.mrb[10].mxu1 }
 0xa51   :  { %v2643_v54 = vpop.f32.mrb[11].mxu1  ;;  %2681 = vmatprep.mubr.f32.mxu1 %v2152_v56 }
 0xa54   :  { %v2225_v37 = vpop.f32.mrb[22].mxu0 }
 0xa55   :  { %v2648_v40 = vpop.f32.mrb[23].mxu0  ;;  %2682 = vmatmul.mubr.f32.vlgmr.msra.gmra.mrb[12].mxu1 %v2225_v37 }
 0xb28   :  { %v2683_v63 = vpop.f32.mrb[12].mxu1 }
 0xb29   :  { %v2301_v26 = vadd.f32 %v2683_v63, %v3672_v22  ;;  %v2295_v1 = vpop.f32.mrb[13].mxu1 }
 0xb2a   :  { %v2296_v35 = vadd.f32 %v2295_v1, %v3672_v22 }
 0xb2b   :  { %v2305_v12 = vmax.f32 %v2301_v26, 0.0 }
 0xb2c   :  { %v2304_v19 = vmax.f32 %v2296_v35, 0.0 }
 0xb2d   :  { %v2307_v15 = vmax.f32 %v2305_v12, 0.0 }
 0xb2e   :  { %v2306_v13 = vmax.f32 %v2304_v19, 0.0 }
 0xb2f   :  { %2309 = vst [vmem:[#allocation12 + $0x8] sm:$0xff] %v2307_v15 }
 0xb30   :  { %2308 = vst [vmem:[#allocation12] sm:$0xff] %v2306_v13 }
 0xb31   :  { %3056 = shalt.err (!%p3053_p13)
}
 0xb32   :  { %s3057_s17 = scalar_lea.hbm %s3737_s7, 256 }
 0xb33   :  { %p3058_p0 = scmp.ne.s32.totalorder %s3737_s7, %s3057_s17  ;;  %p3061_p1 = scmp.lt.u32.totalorder %s3057_s17, %s3737_s7 }
 0xb35   :  { %p3063_p2 = pnand %p3061_p1, %p3058_p0 }
 0xb37   :  { %3066 = shalt.err (!%p3063_p2)
}
 0xb38   :  { %2321 = dma.vmem_to_hbm [thread:$0]  %s2316_s15, 256, %s3737_s7, [#allocation4], %s3079_s13, %s3079_s13, %s3080_s14  }
 0xb39   :  { %3075 = dma.done.wait [#allocation4], 256  }
 0xb3a   :  { %3076 = vsyncadd [#allocation4], 4294967040 }
 0xb3b   :  { %2325 = vsyncpa [#allocation3], 1 }
 0xb3c   :  { %2326 = vsyncpa [#allocation7], 1 }
 0xb3d   :  { %2327 = vsyncpa [#allocation10], 1 }
 0xb3e   :  { %2328 = vsyncpa [#allocation4], 1 }
 0xb3f   :  { %2329 = vsyncpa [#allocation5], 1 }

</bundles_post_ra>
